<compile_context>
chip_gen: v7x
topology: tpu7x:2x2x1
jax: 0.10.0
libtpu: 0.0.40
codegen_flags: <defaults>
</compile_context>

<pallas_src>
import functools

import jax
import jax.numpy as jnp
from jax.experimental import pallas as pl
from jax.experimental.pallas import tpu as pltpu


def _round_up(x, m):
    return ((x + m - 1) // m) * m


def _conv_weight_to_mat(w_oihw, cin_pad):
    """OIHW (Co, Ci, 3, 3) -> (Co, 9*cin_pad); tap k=ky*3+kx major, cin minor."""
    co, ci, kh, kw = w_oihw.shape
    w = jnp.transpose(w_oihw, (0, 2, 3, 1))                     # (Co, ky, kx, Ci)
    w = jnp.pad(w, ((0, 0), (0, 0), (0, 0), (0, cin_pad - ci)))
    return w.reshape(co, kh * kw * cin_pad)


def _flat_sizes(W, TH):
    """Flat-layout sizes for one row tile (row stride W+4)."""
    W4 = W + 4
    P1 = (TH + 2) * W4                      # conv1 flat output length (incl. junk cols)
    P2 = TH * W4                            # conv2 flat output length (incl. junk cols)
    P2p = _round_up(P2, 128)                # lane-dense output length
    L1 = _round_up(2 * W4 + 2 + P2p, 128)   # intermediate length (covers all conv2 reads)
    Lx = _round_up(2 * W4 + 2 + L1, 128)    # input-tile length (covers all conv1 reads)
    return W4, P1, P2, P2p, L1, Lx


def _vmem_estimate(W, TH, Cin_p, Cmid_p, Cout):
    """Rough per-grid-step VMEM bytes (scratches + double-buffered blocks)."""
    _, _, _, P2p, L1, Lx = _flat_sizes(W, TH)
    K1, K2 = 9 * Cin_p, 9 * Cmid_p
    scratch = 2 * (K1 * L1 + Cmid_p * L1 + K2 * P2p)            # bf16 scratches
    in_blocks = 2 * (Cin_p * Lx * 2 + L1 * 2)                   # double-buffered inputs
    out_blocks = 2 * (Cout * P2p * 4)                           # double-buffered output
    consts = 2 * (Cmid_p * K1 + Cout * K2) + 4 * 2 * (Cmid_p + Cout)
    return scratch + in_blocks + out_blocks + consts


# ---------------------------------------------------------------------------
# Fused (conv3x3 -> folded BN -> ReLU) x 2, NCHW in / NCHW out
# ---------------------------------------------------------------------------
def _double_conv_fused(x_nchw, w1, s1, b1, w2, s2, b2, *, row_tile=None,
                       vmem_budget_bytes=48 * 1024 * 1024):
    N, Cin, H, W = x_nchw.shape
    Cmid = w1.shape[0]
    Cout = w2.shape[0]

    # Channel padding to multiples of 16 => bf16 sublane-tile-aligned im2col slabs.
    Cin_p = _round_up(max(Cin, 16), 16)
    Cmid_p = _round_up(max(Cmid, 16), 16)

    if row_tile is None:
        # VMEM-budget-driven row tile (largest divisor of H that fits the budget).
        divisors = [d for d in range(1, H + 1) if H % d == 0]
        fits = [d for d in divisors
                if _vmem_estimate(W, d, Cin_p, Cmid_p, Cout) <= vmem_budget_bytes]
        cand = fits if fits else [divisors[0]]
        # With batch 1, keep >=2 grid steps so both v7x TensorCores get work.
        if N == 1 and any(d < H for d in cand):
            cand = [d for d in cand if d < H]
        row_tile = max(cand)
    TH = row_tile
    assert H % TH == 0, f"row_tile {TH} must divide H={H}"
    T = H // TH

    W4, P1, P2, P2p, L1, Lx = _flat_sizes(W, TH)
    K1, K2 = 9 * Cin_p, 9 * Cmid_p

    # ---- host-side layout glue (single pad pass, no tail re-pad, bf16) ----
    xp = jnp.pad(x_nchw.astype(jnp.bfloat16),
                 ((0, 0), (0, Cin_p - Cin), (2, 2), (2, 2)))     # (N, Cin_p, H+4, W4)
    xp_flat = xp.reshape(N, Cin_p, (H + 4) * W4)
    xp_flat = jnp.pad(xp_flat, ((0, 0), (0, 0), (0, Lx - (TH + 4) * W4)))
    # Overlapping (2-row halo) windows; junk past each window's real data is
    # never read by a mask-surviving output position.
    x_win = jnp.stack(
        [xp_flat[:, :, t * TH * W4: t * TH * W4 + Lx] for t in range(T)],
        axis=1)                                                  # (N, T, Cin_p, Lx) bf16

    # Mask that turns the conv1 result into conv2's zero-padded input: zeroes
    # the pad ring (cols 0 / W+1 per row, rows -1 / H at the image border) and
    # the flat-layout junk lanes.
    p = jnp.arange(L1)
    i_row = p // W4
    j_col = p % W4
    base = (p < P1) & (j_col >= 1) & (j_col <= W)
    t_idx = jnp.arange(T)[:, None]
    row_ok = ~((t_idx == 0) & (i_row[None, :] == 0))
    row_ok &= ~((t_idx == T - 1) & (i_row[None, :] == TH + 1))
    mask = (base[None, :] & row_ok).astype(jnp.bfloat16).reshape(T, 1, L1)

    w1m = _conv_weight_to_mat(w1, Cin_p)
    w1m = jnp.pad(w1m, ((0, Cmid_p - Cmid), (0, 0))).astype(jnp.bfloat16)   # (Cmid_p, K1)
    w2m = _conv_weight_to_mat(w2, Cmid_p).astype(jnp.bfloat16)              # (Cout,  K2)
    s1c = jnp.pad(s1.astype(jnp.float32), (0, Cmid_p - Cmid)).reshape(Cmid_p, 1)
    b1c = jnp.pad(b1.astype(jnp.float32), (0, Cmid_p - Cmid)).reshape(Cmid_p, 1)
    s2c = s2.astype(jnp.float32).reshape(Cout, 1)
    b2c = b2.astype(jnp.float32).reshape(Cout, 1)

    taps = [(ky, kx) for ky in range(3) for kx in range(3)]

    def kernel(x_ref, m_ref, w1_ref, s1_ref, b1_ref, w2_ref, s2_ref, b2_ref,
               o_ref, xc1_ref, h_ref, xc2_ref):
        # ---- layer 1: in-VMEM bf16 im2col (9 lane-shifted flat views) + ONE
        # K=9*Cin matmul + fused BN/ReLU, lane-dense (C, spatial) layout.
        for k, (ky, kx) in enumerate(taps):
            s = ky * W4 + kx
            xc1_ref[k * Cin_p:(k + 1) * Cin_p, :] = x_ref[:, s:s + L1]
        h = jnp.dot(w1_ref[...], xc1_ref[...],
                    preferred_element_type=jnp.float32)            # (Cmid_p, L1) f32
        h = jnp.maximum(h * s1_ref[...] + b1_ref[...], 0.0)
        h_ref[...] = h.astype(jnp.bfloat16) * m_ref[...]            # conv2's padded input

        # ---- layer 2: same trick on the VMEM-resident bf16 intermediate.
        for k, (ky, kx) in enumerate(taps):
            s = ky * W4 + kx
            xc2_ref[k * Cmid_p:(k + 1) * Cmid_p, :] = h_ref[:, s:s + P2p]
        y = jnp.dot(w2_ref[...], xc2_ref[...],
                    preferred_element_type=jnp.float32)             # (Cout, P2p) f32
        y = jnp.maximum(y * s2_ref[...] + b2_ref[...], 0.0)
        o_ref[...] = y.astype(o_ref.dtype)

    # Grid-invariant operands: single-buffered.
    def const_spec(shape):
        return pl.BlockSpec(shape, lambda n, t: (0, 0),
                            pipeline_mode=pl.Buffered(1))

    out_flat = pl.pallas_call(
        kernel,
        out_shape=jax.ShapeDtypeStruct((N, Cout, T * P2p), jnp.float32),
        grid_spec=pltpu.PrefetchScalarGridSpec(
            num_scalar_prefetch=0,
            grid=(N, T),
            in_specs=[
                pl.BlockSpec((None, None, Cin_p, Lx), lambda n, t: (n, t, 0, 0)),
                pl.BlockSpec((None, 1, L1), lambda n, t: (t, 0, 0)),
                const_spec((Cmid_p, K1)),
                const_spec((Cmid_p, 1)),
                const_spec((Cmid_p, 1)),
                const_spec((Cout, K2)),
                const_spec((Cout, 1)),
                const_spec((Cout, 1)),
            ],
            # (N, Cout, T*P2p): no host transpose afterwards; lane-dense stores.
            out_specs=pl.BlockSpec((None, Cout, P2p), lambda n, t: (n, 0, t)),
            scratch_shapes=[
                pltpu.VMEM((K1, L1), jnp.bfloat16),      # conv1 im2col
                pltpu.VMEM((Cmid_p, L1), jnp.bfloat16),  # intermediate (conv2 input)
                pltpu.VMEM((K2, P2p), jnp.bfloat16),     # conv2 im2col
            ],
        ),
        compiler_params=pltpu.CompilerParams(
            dimension_semantics=("parallel", "parallel"),
            vmem_limit_bytes=64 * 1024 * 1024,
        ),
    )(x_win, mask, w1m, s1c, b1c, w2m, s2c, b2c)

    # Drop the lane/column padding; T and TH are adjacent so no transpose needed.
    out = out_flat.reshape(N, Cout, T, P2p)[..., :P2]
    out = out.reshape(N, Cout, H, W4)[..., :W]
    return out


# ---------------------------------------------------------------------------
# Glue ops (plain JAX, NCHW): bilinear 2x upsample (align_corners=True), pad, concat
# ---------------------------------------------------------------------------
def _bilinear_upsample_2x_align_corners(x_nchw):
    """Matches nn.Upsample(scale_factor=2, mode='bilinear', align_corners=True)."""
    N, C, H, W = x_nchw.shape
    Ho, Wo = 2 * H, 2 * W

    def coords(size_in, size_out):
        if size_in == 1:
            z = jnp.zeros((size_out,), jnp.int32)
            return z, z, jnp.zeros((size_out,), x_nchw.dtype)
        s = jnp.arange(size_out, dtype=jnp.float32) * (size_in - 1) / (size_out - 1)
        lo = jnp.floor(s).astype(jnp.int32)
        hi = jnp.minimum(lo + 1, size_in - 1)
        frac = (s - lo.astype(jnp.float32)).astype(x_nchw.dtype)
        return lo, hi, frac

    y0, y1, wy = coords(H, Ho)
    x0, x1, wx = coords(W, Wo)
    rows = (x_nchw[:, :, y0, :] * (1.0 - wy)[None, None, :, None]
            + x_nchw[:, :, y1, :] * wy[None, None, :, None])
    out = (rows[:, :, :, x0] * (1.0 - wx)[None, None, None, :]
           + rows[:, :, :, x1] * wx[None, None, None, :])
    return out


def _upsample_pad_concat(x1, x2):
    x1u = _bilinear_upsample_2x_align_corners(x1)
    diffY = x2.shape[2] - x1u.shape[2]
    diffX = x2.shape[3] - x1u.shape[3]
    x1p = jnp.pad(
        x1u,
        ((0, 0), (0, 0),
         (diffY // 2, diffY - diffY // 2),
         (diffX // 2, diffX - diffX // 2)))
    return jnp.concatenate([x2, x1p], axis=1)      # NCHW, channels = in_channels


def upscaling_forward(params, x1, x2, *, row_tile=None):
    """Pallas-backed forward. x1: (N, C/2, H, W), x2: (N, C/2, 2H, 2W), NCHW."""
    x = _upsample_pad_concat(x1, x2)
    return _double_conv_fused(
        x, params["w1"], params["scale1"], params["bias1"],
        params["w2"], params["scale2"], params["bias2"], row_tile=row_tile)


# ---------------------------------------------------------------------------
# Pure-JAX reference (for correctness check)
# ---------------------------------------------------------------------------
def _ref_conv_bn_relu(x_nchw, w_oihw, scale, bias):
    y = jax.lax.conv_general_dilated(
        x_nchw, w_oihw, window_strides=(1, 1), padding="SAME",
        dimension_numbers=("NCHW", "OIHW", "NCHW"))
    y = y * scale[None, :, None, None] + bias[None, :, None, None]
    return jnp.maximum(y, 0.0)


def upscaling_reference(params, x1, x2):
    x = _upsample_pad_concat(x1, x2)
    h = _ref_conv_bn_relu(x, params["w1"], params["scale1"], params["bias1"])
    return _ref_conv_bn_relu(h, params["w2"], params["scale2"], params["bias2"])


# ---------------------------------------------------------------------------
if __name__ == "__main__":
    key = jax.random.PRNGKey(0)
    N = 2
    in_channels, out_channels = 8, 8
    mid_channels = in_channels // 2          # bilinear=True branch of Upscaling
    H1 = W1 = 8                              # x1 spatial
    H2 = W2 = 16                             # x2 spatial (= 2 * x1 spatial)

    ks = jax.random.split(key, 8)
    # UNet convention: x1 and x2 each carry in_channels // 2 channels, so the
    # channel concatenation has in_channels channels.
    x1 = jax.random.normal(ks[0], (N, in_channels // 2, H1, W1), jnp.float32)
    x2 = jax.random.normal(ks[1], (N, in_channels // 2, H2, W2), jnp.float32)

    # Conv weights in PyTorch OIHW layout, no bias.
    w1 = 0.1 * jax.random.normal(ks[2], (mid_channels, in_channels, 3, 3), jnp.float32)
    w2 = 0.1 * jax.random.normal(ks[3], (out_channels, mid_channels, 3, 3), jnp.float32)

    # BatchNorm in inference form, folded to a per-channel scale/bias.
    eps = 1e-5
    gamma1 = 1.0 + 0.1 * jax.random.normal(ks[4], (mid_channels,), jnp.float32)
    beta1 = 0.1 * jax.random.normal(ks[5], (mid_channels,), jnp.float32)
    gamma2 = 1.0 + 0.1 * jax.random.normal(ks[6], (out_channels,), jnp.float32)
    beta2 = 0.1 * jax.random.normal(ks[7], (out_channels,), jnp.float32)
    rmean1 = jnp.zeros((mid_channels,), jnp.float32)
    rvar1 = jnp.ones((mid_channels,), jnp.float32)
    rmean2 = jnp.zeros((out_channels,), jnp.float32)
    rvar2 = jnp.ones((out_channels,), jnp.float32)

    scale1 = gamma1 / jnp.sqrt(rvar1 + eps)
    bias1 = beta1 - rmean1 * scale1
    scale2 = gamma2 / jnp.sqrt(rvar2 + eps)
    bias2 = beta2 - rmean2 * scale2

    params = dict(w1=w1, scale1=scale1, bias1=bias1,
                  w2=w2, scale2=scale2, bias2=bias2)

    ref = jax.block_until_ready(upscaling_reference(params, x1, x2))

    # row_tile=8 -> 2 row tiles per image: exercises the halo/tiling path and
    # gives a 4-step, fully parallel grid (feeds both v7x TensorCores).
    fwd_tiled = jax.jit(functools.partial(upscaling_forward, row_tile=8))
    out = jax.block_until_ready(fwd_tiled(params, x1, x2))
    assert out.shape == (N, out_channels, H2, W2), out.shape
    max_err = float(jnp.max(jnp.abs(out - ref)))
    assert jnp.allclose(out, ref, atol=5e-2, rtol=5e-2), f"max_err={max_err}"

    # Default (VMEM-budget-driven) row tile: single tile per image here.
    fwd_auto = jax.jit(upscaling_forward)
    out2 = jax.block_until_ready(fwd_auto(params, x1, x2))
    max_err2 = float(jnp.max(jnp.abs(out2 - ref)))
    assert jnp.allclose(out2, ref, atol=5e-2, rtol=5e-2), f"max_err={max_err2}"

    print("KERNEL_OK")
</pallas_src>

<mosaic_0001>
module attributes {stable_mosaic.version = 11 : i64} {
  func.func @kernel(%arg0: i32, %arg1: i32, %arg2: memref<1x1x16x512xbf16, #tpu.memory_space<vmem>>, %arg3: memref<1x1x384xbf16, #tpu.memory_space<vmem>>, %arg4: memref<16x144xbf16, #tpu.memory_space<vmem>>, %arg5: memref<16x1xf32, #tpu.memory_space<vmem>>, %arg6: memref<16x1xf32, #tpu.memory_space<vmem>>, %arg7: memref<8x144xbf16, #tpu.memory_space<vmem>>, %arg8: memref<8x1xf32, #tpu.memory_space<vmem>>, %arg9: memref<8x1xf32, #tpu.memory_space<vmem>>, %arg10: memref<1x8x256xf32, #tpu.memory_space<vmem>>, %arg11: memref<144x384xbf16, #tpu.memory_space<vmem>>, %arg12: memref<16x384xbf16, #tpu.memory_space<vmem>>, %arg13: memref<144x256xbf16, #tpu.memory_space<vmem>>) attributes {dimension_semantics = [#tpu.dimension_semantics<parallel>, #tpu.dimension_semantics<parallel>], iteration_bounds = array<i64: 2, 2>, scalar_prefetch = 0 : i64, scratch_operands = 3 : i64, tpu.core_type = #tpu.core_type<tc>, window_params = [{transform_indices = @transform_0, window_bounds = array<i64: 1, 1, 16, 512>}, {transform_indices = @transform_1, window_bounds = array<i64: 1, 1, 384>}, {pipeline_mode = #tpu.pipeline_mode<synchronous>, transform_indices = @transform_2, window_bounds = array<i64: 16, 144>}, {pipeline_mode = #tpu.pipeline_mode<synchronous>, transform_indices = @transform_3, window_bounds = array<i64: 16, 1>}, {pipeline_mode = #tpu.pipeline_mode<synchronous>, transform_indices = @transform_4, window_bounds = array<i64: 16, 1>}, {pipeline_mode = #tpu.pipeline_mode<synchronous>, transform_indices = @transform_5, window_bounds = array<i64: 8, 144>}, {pipeline_mode = #tpu.pipeline_mode<synchronous>, transform_indices = @transform_6, window_bounds = array<i64: 8, 1>}, {pipeline_mode = #tpu.pipeline_mode<synchronous>, transform_indices = @transform_7, window_bounds = array<i64: 8, 1>}, {transform_indices = @transform_8, window_bounds = array<i64: 1, 8, 256>}]} {
    %c0 = arith.constant 0 : index
    %c0_0 = arith.constant 0 : index
    %c0_1 = arith.constant 0 : index
    %c0_2 = arith.constant 0 : index
    %0 = vector.load %arg2[%c0, %c0_0, %c0_1, %c0_2] : memref<1x1x16x512xbf16, #tpu.memory_space<vmem>>, vector<1x1x16x384xbf16>
    %1 = vector.shape_cast %0 : vector<1x1x16x384xbf16> to vector<16x384xbf16>
    %c0_3 = arith.constant 0 : index
    %c0_4 = arith.constant 0 : index
    %2 = vector.load %arg11[%c0_3, %c0_4] : memref<144x384xbf16, #tpu.memory_space<vmem>>, vector<16x384xbf16>
    tpu.vector_store %arg11[%c0_3, %c0_4], %1 {strides = array<i32>} : memref<144x384xbf16, #tpu.memory_space<vmem>>, vector<16x384xbf16>,
    %c0_5 = arith.constant 0 : index
    %c0_6 = arith.constant 0 : index
    %c0_7 = arith.constant 0 : index
    %c1 = arith.constant 1 : index
    %3 = vector.load %arg2[%c0_5, %c0_6, %c0_7, %c1] : memref<1x1x16x512xbf16, #tpu.memory_space<vmem>>, vector<1x1x16x384xbf16>
    %4 = vector.shape_cast %3 : vector<1x1x16x384xbf16> to vector<16x384xbf16>
    %c16 = arith.constant 16 : index
    %c0_8 = arith.constant 0 : index
    %5 = vector.load %arg11[%c16, %c0_8] : memref<144x384xbf16, #tpu.memory_space<vmem>>, vector<16x384xbf16>
    tpu.vector_store %arg11[%c16, %c0_8], %4 {strides = array<i32>} : memref<144x384xbf16, #tpu.memory_space<vmem>>, vector<16x384xbf16>,
    %c0_9 = arith.constant 0 : index
    %c0_10 = arith.constant 0 : index
    %c0_11 = arith.constant 0 : index
    %c2 = arith.constant 2 : index
    %6 = vector.load %arg2[%c0_9, %c0_10, %c0_11, %c2] : memref<1x1x16x512xbf16, #tpu.memory_space<vmem>>, vector<1x1x16x384xbf16>
    %7 = vector.shape_cast %6 : vector<1x1x16x384xbf16> to vector<16x384xbf16>
    %c32 = arith.constant 32 : index
    %c0_12 = arith.constant 0 : index
    %8 = vector.load %arg11[%c32, %c0_12] : memref<144x384xbf16, #tpu.memory_space<vmem>>, vector<16x384xbf16>
    tpu.vector_store %arg11[%c32, %c0_12], %7 {strides = array<i32>} : memref<144x384xbf16, #tpu.memory_space<vmem>>, vector<16x384xbf16>,
    %c0_13 = arith.constant 0 : index
    %c0_14 = arith.constant 0 : index
    %c0_15 = arith.constant 0 : index
    %c20 = arith.constant 20 : index
    %9 = vector.load %arg2[%c0_13, %c0_14, %c0_15, %c20] : memref<1x1x16x512xbf16, #tpu.memory_space<vmem>>, vector<1x1x16x384xbf16>
    %10 = vector.shape_cast %9 : vector<1x1x16x384xbf16> to vector<16x384xbf16>
    %c48 = arith.constant 48 : index
    %c0_16 = arith.constant 0 : index
    %11 = vector.load %arg11[%c48, %c0_16] : memref<144x384xbf16, #tpu.memory_space<vmem>>, vector<16x384xbf16>
    tpu.vector_store %arg11[%c48, %c0_16], %10 {strides = array<i32>} : memref<144x384xbf16, #tpu.memory_space<vmem>>, vector<16x384xbf16>,
    %c0_17 = arith.constant 0 : index
    %c0_18 = arith.constant 0 : index
    %c0_19 = arith.constant 0 : index
    %c21 = arith.constant 21 : index
    %12 = vector.load %arg2[%c0_17, %c0_18, %c0_19, %c21] : memref<1x1x16x512xbf16, #tpu.memory_space<vmem>>, vector<1x1x16x384xbf16>
    %13 = vector.shape_cast %12 : vector<1x1x16x384xbf16> to vector<16x384xbf16>
    %c64 = arith.constant 64 : index
    %c0_20 = arith.constant 0 : index
    %14 = vector.load %arg11[%c64, %c0_20] : memref<144x384xbf16, #tpu.memory_space<vmem>>, vector<16x384xbf16>
    tpu.vector_store %arg11[%c64, %c0_20], %13 {strides = array<i32>} : memref<144x384xbf16, #tpu.memory_space<vmem>>, vector<16x384xbf16>,
    %c0_21 = arith.constant 0 : index
    %c0_22 = arith.constant 0 : index
    %c0_23 = arith.constant 0 : index
    %c22 = arith.constant 22 : index
    %15 = vector.load %arg2[%c0_21, %c0_22, %c0_23, %c22] : memref<1x1x16x512xbf16, #tpu.memory_space<vmem>>, vector<1x1x16x384xbf16>
    %16 = vector.shape_cast %15 : vector<1x1x16x384xbf16> to vector<16x384xbf16>
    %c80 = arith.constant 80 : index
    %c0_24 = arith.constant 0 : index
    %17 = vector.load %arg11[%c80, %c0_24] : memref<144x384xbf16, #tpu.memory_space<vmem>>, vector<16x384xbf16>
    tpu.vector_store %arg11[%c80, %c0_24], %16 {strides = array<i32>} : memref<144x384xbf16, #tpu.memory_space<vmem>>, vector<16x384xbf16>,
    %c0_25 = arith.constant 0 : index
    %c0_26 = arith.constant 0 : index
    %c0_27 = arith.constant 0 : index
    %c40 = arith.constant 40 : index
    %18 = vector.load %arg2[%c0_25, %c0_26, %c0_27, %c40] : memref<1x1x16x512xbf16, #tpu.memory_space<vmem>>, vector<1x1x16x384xbf16>
    %19 = vector.shape_cast %18 : vector<1x1x16x384xbf16> to vector<16x384xbf16>
    %c96 = arith.constant 96 : index
    %c0_28 = arith.constant 0 : index
    %20 = vector.load %arg11[%c96, %c0_28] : memref<144x384xbf16, #tpu.memory_space<vmem>>, vector<16x384xbf16>
    tpu.vector_store %arg11[%c96, %c0_28], %19 {strides = array<i32>} : memref<144x384xbf16, #tpu.memory_space<vmem>>, vector<16x384xbf16>,
    %c0_29 = arith.constant 0 : index
    %c0_30 = arith.constant 0 : index
    %c0_31 = arith.constant 0 : index
    %c41 = arith.constant 41 : index
    %21 = vector.load %arg2[%c0_29, %c0_30, %c0_31, %c41] : memref<1x1x16x512xbf16, #tpu.memory_space<vmem>>, vector<1x1x16x384xbf16>
    %22 = vector.shape_cast %21 : vector<1x1x16x384xbf16> to vector<16x384xbf16>
    %c112 = arith.constant 112 : index
    %c0_32 = arith.constant 0 : index
    %23 = vector.load %arg11[%c112, %c0_32] : memref<144x384xbf16, #tpu.memory_space<vmem>>, vector<16x384xbf16>
    tpu.vector_store %arg11[%c112, %c0_32], %22 {strides = array<i32>} : memref<144x384xbf16, #tpu.memory_space<vmem>>, vector<16x384xbf16>,
    %c0_33 = arith.constant 0 : index
    %c0_34 = arith.constant 0 : index
    %c0_35 = arith.constant 0 : index
    %c42 = arith.constant 42 : index
    %24 = vector.load %arg2[%c0_33, %c0_34, %c0_35, %c42] : memref<1x1x16x512xbf16, #tpu.memory_space<vmem>>, vector<1x1x16x384xbf16>
    %25 = vector.shape_cast %24 : vector<1x1x16x384xbf16> to vector<16x384xbf16>
    %c128 = arith.constant 128 : index
    %c0_36 = arith.constant 0 : index
    %26 = vector.load %arg11[%c128, %c0_36] : memref<144x384xbf16, #tpu.memory_space<vmem>>, vector<16x384xbf16>
    tpu.vector_store %arg11[%c128, %c0_36], %25 {strides = array<i32>} : memref<144x384xbf16, #tpu.memory_space<vmem>>, vector<16x384xbf16>,
    %c0_37 = arith.constant 0 : index
    %c0_38 = arith.constant 0 : index
    %27 = vector.load %arg4[%c0_37, %c0_38] : memref<16x144xbf16, #tpu.memory_space<vmem>>, vector<16x144xbf16>
    %c0_39 = arith.constant 0 : index
    %c0_40 = arith.constant 0 : index
    %28 = vector.load %arg11[%c0_39, %c0_40] : memref<144x384xbf16, #tpu.memory_space<vmem>>, vector<144x384xbf16>
    %cst = arith.constant dense<0.000000e+00> : vector<16x384xf32>
    %29 = tpu.matmul %27, %28, %cst {dimension_numbers = #tpu.dot_dimension_numbers<[1], [0], [0], [1], [0, 0, 1, 1], [], []>} : vector<16x144xbf16>, vector<144x384xbf16>, vector<16x384xf32> -> vector<16x384xf32>
    %c0_41 = arith.constant 0 : index
    %c0_42 = arith.constant 0 : index
    %30 = vector.load %arg5[%c0_41, %c0_42] : memref<16x1xf32, #tpu.memory_space<vmem>>, vector<16x1xf32>
    %31 = vector.broadcast %30 : vector<16x1xf32> to vector<16x384xf32>
    %32 = arith.mulf %29, %31 : vector<16x384xf32>
    %c0_43 = arith.constant 0 : index
    %c0_44 = arith.constant 0 : index
    %33 = vector.load %arg6[%c0_43, %c0_44] : memref<16x1xf32, #tpu.memory_space<vmem>>, vector<16x1xf32>
    %34 = vector.broadcast %33 : vector<16x1xf32> to vector<16x384xf32>
    %35 = arith.addf %32, %34 : vector<16x384xf32>
    %cst_45 = arith.constant 0.000000e+00 : f32
    %36 = vector.broadcast %cst_45 : f32 to vector<16x384xf32>
    %37 = arith.maximumf %35, %36 : vector<16x384xf32>
    %38 = arith.truncf %37 : vector<16x384xf32> to vector<16x384xbf16>
    %c0_46 = arith.constant 0 : index
    %c0_47 = arith.constant 0 : index
    %c0_48 = arith.constant 0 : index
    %39 = vector.load %arg3[%c0_46, %c0_47, %c0_48] : memref<1x1x384xbf16, #tpu.memory_space<vmem>>, vector<1x1x384xbf16>
    %40 = vector.shape_cast %39 : vector<1x1x384xbf16> to vector<1x384xbf16>
    %41 = vector.broadcast %40 : vector<1x384xbf16> to vector<16x384xbf16>
    %42 = arith.mulf %38, %41 : vector<16x384xbf16>
    %c0_49 = arith.constant 0 : index
    %c0_50 = arith.constant 0 : index
    %43 = vector.load %arg12[%c0_49, %c0_50] : memref<16x384xbf16, #tpu.memory_space<vmem>>, vector<16x384xbf16>
    tpu.vector_store %arg12[%c0_49, %c0_50], %42 {strides = array<i32>} : memref<16x384xbf16, #tpu.memory_space<vmem>>, vector<16x384xbf16>,
    %c0_51 = arith.constant 0 : index
    %c0_52 = arith.constant 0 : index
    %44 = vector.load %arg12[%c0_51, %c0_52] : memref<16x384xbf16, #tpu.memory_space<vmem>>, vector<16x256xbf16>
    %c0_53 = arith.constant 0 : index
    %c0_54 = arith.constant 0 : index
    %45 = vector.load %arg13[%c0_53, %c0_54] : memref<144x256xbf16, #tpu.memory_space<vmem>>, vector<16x256xbf16>
    tpu.vector_store %arg13[%c0_53, %c0_54], %44 {strides = array<i32>} : memref<144x256xbf16, #tpu.memory_space<vmem>>, vector<16x256xbf16>,
    %c0_55 = arith.constant 0 : index
    %c1_56 = arith.constant 1 : index
    %46 = vector.load %arg12[%c0_55, %c1_56] : memref<16x384xbf16, #tpu.memory_space<vmem>>, vector<16x256xbf16>
    %c16_57 = arith.constant 16 : index
    %c0_58 = arith.constant 0 : index
    %47 = vector.load %arg13[%c16_57, %c0_58] : memref<144x256xbf16, #tpu.memory_space<vmem>>, vector<16x256xbf16>
    tpu.vector_store %arg13[%c16_57, %c0_58], %46 {strides = array<i32>} : memref<144x256xbf16, #tpu.memory_space<vmem>>, vector<16x256xbf16>,
    %c0_59 = arith.constant 0 : index
    %c2_60 = arith.constant 2 : index
    %48 = vector.load %arg12[%c0_59, %c2_60] : memref<16x384xbf16, #tpu.memory_space<vmem>>, vector<16x256xbf16>
    %c32_61 = arith.constant 32 : index
    %c0_62 = arith.constant 0 : index
    %49 = vector.load %arg13[%c32_61, %c0_62] : memref<144x256xbf16, #tpu.memory_space<vmem>>, vector<16x256xbf16>
    tpu.vector_store %arg13[%c32_61, %c0_62], %48 {strides = array<i32>} : memref<144x256xbf16, #tpu.memory_space<vmem>>, vector<16x256xbf16>,
    %c0_63 = arith.constant 0 : index
    %c20_64 = arith.constant 20 : index
    %50 = vector.load %arg12[%c0_63, %c20_64] : memref<16x384xbf16, #tpu.memory_space<vmem>>, vector<16x256xbf16>
    %c48_65 = arith.constant 48 : index
    %c0_66 = arith.constant 0 : index
    %51 = vector.load %arg13[%c48_65, %c0_66] : memref<144x256xbf16, #tpu.memory_space<vmem>>, vector<16x256xbf16>
    tpu.vector_store %arg13[%c48_65, %c0_66], %50 {strides = array<i32>} : memref<144x256xbf16, #tpu.memory_space<vmem>>, vector<16x256xbf16>,
    %c0_67 = arith.constant 0 : index
    %c21_68 = arith.constant 21 : index
    %52 = vector.load %arg12[%c0_67, %c21_68] : memref<16x384xbf16, #tpu.memory_space<vmem>>, vector<16x256xbf16>
    %c64_69 = arith.constant 64 : index
    %c0_70 = arith.constant 0 : index
    %53 = vector.load %arg13[%c64_69, %c0_70] : memref<144x256xbf16, #tpu.memory_space<vmem>>, vector<16x256xbf16>
    tpu.vector_store %arg13[%c64_69, %c0_70], %52 {strides = array<i32>} : memref<144x256xbf16, #tpu.memory_space<vmem>>, vector<16x256xbf16>,
    %c0_71 = arith.constant 0 : index
    %c22_72 = arith.constant 22 : index
    %54 = vector.load %arg12[%c0_71, %c22_72] : memref<16x384xbf16, #tpu.memory_space<vmem>>, vector<16x256xbf16>
    %c80_73 = arith.constant 80 : index
    %c0_74 = arith.constant 0 : index
    %55 = vector.load %arg13[%c80_73, %c0_74] : memref<144x256xbf16, #tpu.memory_space<vmem>>, vector<16x256xbf16>
    tpu.vector_store %arg13[%c80_73, %c0_74], %54 {strides = array<i32>} : memref<144x256xbf16, #tpu.memory_space<vmem>>, vector<16x256xbf16>,
    %c0_75 = arith.constant 0 : index
    %c40_76 = arith.constant 40 : index
    %56 = vector.load %arg12[%c0_75, %c40_76] : memref<16x384xbf16, #tpu.memory_space<vmem>>, vector<16x256xbf16>
    %c96_77 = arith.constant 96 : index
    %c0_78 = arith.constant 0 : index
    %57 = vector.load %arg13[%c96_77, %c0_78] : memref<144x256xbf16, #tpu.memory_space<vmem>>, vector<16x256xbf16>
    tpu.vector_store %arg13[%c96_77, %c0_78], %56 {strides = array<i32>} : memref<144x256xbf16, #tpu.memory_space<vmem>>, vector<16x256xbf16>,
    %c0_79 = arith.constant 0 : index
    %c41_80 = arith.constant 41 : index
    %58 = vector.load %arg12[%c0_79, %c41_80] : memref<16x384xbf16, #tpu.memory_space<vmem>>, vector<16x256xbf16>
    %c112_81 = arith.constant 112 : index
    %c0_82 = arith.constant 0 : index
    %59 = vector.load %arg13[%c112_81, %c0_82] : memref<144x256xbf16, #tpu.memory_space<vmem>>, vector<16x256xbf16>
    tpu.vector_store %arg13[%c112_81, %c0_82], %58 {strides = array<i32>} : memref<144x256xbf16, #tpu.memory_space<vmem>>, vector<16x256xbf16>,
    %c0_83 = arith.constant 0 : index
    %c42_84 = arith.constant 42 : index
    %60 = vector.load %arg12[%c0_83, %c42_84] : memref<16x384xbf16, #tpu.memory_space<vmem>>, vector<16x256xbf16>
    %c128_85 = arith.constant 128 : index
    %c0_86 = arith.constant 0 : index
    %61 = vector.load %arg13[%c128_85, %c0_86] : memref<144x256xbf16, #tpu.memory_space<vmem>>, vector<16x256xbf16>
    tpu.vector_store %arg13[%c128_85, %c0_86], %60 {strides = array<i32>} : memref<144x256xbf16, #tpu.memory_space<vmem>>, vector<16x256xbf16>,
    %c0_87 = arith.constant 0 : index
    %c0_88 = arith.constant 0 : index
    %62 = vector.load %arg7[%c0_87, %c0_88] : memref<8x144xbf16, #tpu.memory_space<vmem>>, vector<8x144xbf16>
    %c0_89 = arith.constant 0 : index
    %c0_90 = arith.constant 0 : index
    %63 = vector.load %arg13[%c0_89, %c0_90] : memref<144x256xbf16, #tpu.memory_space<vmem>>, vector<144x256xbf16>
    %cst_91 = arith.constant dense<0.000000e+00> : vector<8x256xf32>
    %64 = tpu.matmul %62, %63, %cst_91 {dimension_numbers = #tpu.dot_dimension_numbers<[1], [0], [0], [1], [0, 0, 1, 1], [], []>} : vector<8x144xbf16>, vector<144x256xbf16>, vector<8x256xf32> -> vector<8x256xf32>
    %c0_92 = arith.constant 0 : index
    %c0_93 = arith.constant 0 : index
    %65 = vector.load %arg8[%c0_92, %c0_93] : memref<8x1xf32, #tpu.memory_space<vmem>>, vector<8x1xf32>
    %66 = vector.broadcast %65 : vector<8x1xf32> to vector<8x256xf32>
    %67 = arith.mulf %64, %66 : vector<8x256xf32>
    %c0_94 = arith.constant 0 : index
    %c0_95 = arith.constant 0 : index
    %68 = vector.load %arg9[%c0_94, %c0_95] : memref<8x1xf32, #tpu.memory_space<vmem>>, vector<8x1xf32>
    %69 = vector.broadcast %68 : vector<8x1xf32> to vector<8x256xf32>
    %70 = arith.addf %67, %69 : vector<8x256xf32>
    %cst_96 = arith.constant 0.000000e+00 : f32
    %71 = vector.broadcast %cst_96 : f32 to vector<8x256xf32>
    %72 = arith.maximumf %70, %71 : vector<8x256xf32>
    %c0_97 = arith.constant 0 : index
    %c0_98 = arith.constant 0 : index
    %c0_99 = arith.constant 0 : index
    %73 = vector.load %arg10[%c0_97, %c0_98, %c0_99] : memref<1x8x256xf32, #tpu.memory_space<vmem>>, vector<1x8x256xf32>
    %74 = vector.shape_cast %73 : vector<1x8x256xf32> to vector<8x256xf32>
    %75 = vector.shape_cast %72 : vector<8x256xf32> to vector<1x8x256xf32>
    tpu.vector_store %arg10[%c0_97, %c0_98, %c0_99], %75 {strides = array<i32>} : memref<1x8x256xf32, #tpu.memory_space<vmem>>, vector<1x8x256xf32>,
    return
  }
  func.func @transform_0(%arg0: i32, %arg1: i32) -> (i32, i32, i32, i32) {
    %c0_i32 = arith.constant 0 : i32
    %c0_i32_0 = arith.constant 0 : i32
    %c0_i32_1 = arith.constant 0 : i32
    return %arg0, %arg1, %c0_i32, %c0_i32_0 : i32, i32, i32, i32
  }
  func.func @transform_1(%arg0: i32, %arg1: i32) -> (i32, i32, i32) {
    %c0_i32 = arith.constant 0 : i32
    %c0_i32_0 = arith.constant 0 : i32
    %c0_i32_1 = arith.constant 0 : i32
    return %arg1, %c0_i32, %c0_i32_0 : i32, i32, i32
  }
  func.func @transform_2(%arg0: i32, %arg1: i32) -> (i32, i32) {
    %c0_i32 = arith.constant 0 : i32
    %c0_i32_0 = arith.constant 0 : i32
    %c0_i32_1 = arith.constant 0 : i32
    return %c0_i32, %c0_i32_0 : i32, i32
  }
  func.func @transform_3(%arg0: i32, %arg1: i32) -> (i32, i32) {
    %c0_i32 = arith.constant 0 : i32
    %c0_i32_0 = arith.constant 0 : i32
    %c0_i32_1 = arith.constant 0 : i32
    return %c0_i32, %c0_i32_0 : i32, i32
  }
  func.func @transform_4(%arg0: i32, %arg1: i32) -> (i32, i32) {
    %c0_i32 = arith.constant 0 : i32
    %c0_i32_0 = arith.constant 0 : i32
    %c0_i32_1 = arith.constant 0 : i32
    return %c0_i32, %c0_i32_0 : i32, i32
  }
  func.func @transform_5(%arg0: i32, %arg1: i32) -> (i32, i32) {
    %c0_i32 = arith.constant 0 : i32
    %c0_i32_0 = arith.constant 0 : i32
    %c0_i32_1 = arith.constant 0 : i32
    return %c0_i32, %c0_i32_0 : i32, i32
  }
  func.func @transform_6(%arg0: i32, %arg1: i32) -> (i32, i32) {
    %c0_i32 = arith.constant 0 : i32
    %c0_i32_0 = arith.constant 0 : i32
    %c0_i32_1 = arith.constant 0 : i32
    return %c0_i32, %c0_i32_0 : i32, i32
  }
  func.func @transform_7(%arg0: i32, %arg1: i32) -> (i32, i32) {
    %c0_i32 = arith.constant 0 : i32
    %c0_i32_0 = arith.constant 0 : i32
    %c0_i32_1 = arith.constant 0 : i32
    return %c0_i32, %c0_i32_0 : i32, i32
  }
  func.func @transform_8(%arg0: i32, %arg1: i32) -> (i32, i32, i32) {
    %c0_i32 = arith.constant 0 : i32
    %c0_i32_0 = arith.constant 0 : i32
    return %arg0, %c0_i32, %arg1 : i32, i32, i32
  }
}

</mosaic_0001>

<bundles_post_ra>
// kernel: upscaling_forward.1
= control target key start
LH: loop header
LB: loop body
LE: loop exit
PB: predicated region body
PF: predicated region fallthrough
CT: control target
= control target key end

     0   :  { %s2747_s0 = inlined_call_operand.hbm [shape: bf16[2,2,16,512], index: 0, kind: input, shape index: {}]   ;;  %s2748_s1 = inlined_call_operand.hbm [shape: bf16[2,1,384], index: 1, kind: input, shape index: {}]   ;;  %s2749_s2 = inlined_call_operand.hbm [shape: bf16[16,144], index: 2, kind: input, shape index: {}]   ;;  %s2750_s3 = inlined_call_operand.hbm [shape: f32[16,1], index: 3, kind: input, shape index: {}]   ;;  %s2751_s4 = inlined_call_operand.hbm [shape: f32[16,1], index: 4, kind: input, shape index: {}]   ;;  %s2752_s5 = inlined_call_operand.hbm [shape: bf16[8,144], index: 5, kind: input, shape index: {}]   ;;  %s2753_s6 = inlined_call_operand.hbm [shape: f32[8,1], index: 6, kind: input, shape index: {}]   ;;  %s2754_s7 = inlined_call_operand.hbm [shape: f32[8,1], index: 7, kind: input, shape index: {}]   ;;  %s2755_s8 = inlined_call_operand.hbm [shape: f32[2,8,512], index: 8, kind: output, shape index: {}]  }
   0x1   :  { %2767 = sst [smem:[#allocation32_spill]] %s2747_s0 }
   0x2   :  { %2768 = sst [smem:[#allocation33_spill]] %s2748_s1 }
   0x3   :  { %2769 = sst [smem:[#allocation34_spill]] %s2749_s2 }
   0x4   :  { %2770 = sst [smem:[#allocation35_spill]] %s2750_s3 }
   0x5   :  { %2771 = sst [smem:[#allocation36_spill]] %s2751_s4 }
   0x6   :  { %2772 = sst [smem:[#allocation37_spill]] %s2752_s5 }
   0x7   :  { %2773 = sst [smem:[#allocation38_spill]] %s2753_s6 }
   0x8   :  { %2774 = sst [smem:[#allocation39_spill]] %s2755_s8 }
   0x9   :  { %13 = vsyncpa [#allocation6], 0 }
   0xa   :  { %15 = vsyncpa [#allocation6 + $0x1], 0 }
   0xb   :  { %16 = vsyncpa [#allocation9], 0 }
   0xc   :  { %18 = vsyncpa [#allocation9 + $0x1], 0 }
   0xd   :  { %19 = vsyncpa [#allocation12], 0 }
   0xe   :  { %20 = vsyncpa [#allocation15], 0 }
   0xf   :  { %21 = vsyncpa [#allocation18], 0 }
  0x10   :  { %22 = vsyncpa [#allocation7], 0 }
  0x11   :  { %24 = vsyncpa [#allocation7 + $0x1], 0  ;;  %s2146_s27 = smov 0   ;;  %s2148_s28 = smov 0  }
  0x12   :  { %s2150_s29 = smov 0   ;;  %s2152_s30 = smov 0  }
  0x13   :  { %s2154_s9 = smov 0   ;;  %s2156_s10 = smov 0  }
  0x14   :  { %s2158_s11 = smov 0   ;;  %s2160_s12 = smov 0  }
  0x15   :  { %s2162_s13 = smov 0   ;;  %s2164_s14 = smov 0  }
  0x16   :  { %s2166_s15 = smov 0  }
  0x17 LB: > { %2775 = sst [smem:[#allocation27_spill]] %s2036_s27  ;;  %s2202_s16 = sadd.s32 4294967295, %s2076_s15   ;;  %s2076_s15 = sphi %s2166_s15, %s30_s15   ;;  %s2072_s14 = sphi %s2164_s14, %s2831_s14   ;;  %s2068_s13 = sphi %s2162_s13, %s2830_s13   ;;  %s2064_s12 = sphi %s2160_s12, %s2829_s12   ;;  %s2060_s11 = sphi %s2158_s11, %s2828_s11   ;;  %s2056_s10 = sphi %s2156_s10, %s2827_s10   ;;  %s2052_s9 = sphi %s2154_s9, %s2826_s9   ;;  %s2048_s30 = sphi %s2152_s30, %s2825_s30   ;;  %s2044_s29 = sphi %s2150_s29, %s2824_s29   ;;  %s2040_s28 = sphi %s2148_s28, %s2823_s28   ;;  %s2036_s27 = sphi %s2146_s27, %s2822_s27  }
  0x18   : > { %2776 = sst [smem:[#allocation28_spill]] %s2040_s28  ;;  %p1436_p0 = scmp.ge.s32.totalorder %s2076_s15, 1 }
  0x19   : > { %2777 = sst [smem:[#allocation29_spill]] %s2060_s11  ;;  %p2760_p1 = scmp.eq.s32.totalorder %s2202_s16, 0 }
  0x1a   : > { %2778 = sst [smem:[#allocation30_spill]] %s2064_s12  ;;  %p255_p2 = scmp.lt.s32.totalorder %s2076_s15, 5 }
  0x1b   : > { %s2078_s18 = smov [#allocation10]   ;;  %s2079_s21 = smov [#allocation11]  }
  0x1c   : > { %p2207_p3 = pnand %p1436_p0, %p255_p2  ;;  %s267_s19 = sshll.u32 %s2078_s18, 4  ;;  %s2211_s19 = int_to_ptr.vmem [resolvable:$true] %s267_s19 }
  0x1d   : > { %s280_s22 = sshll.u32 %s2079_s21, 4  ;;  %s2080_s23 = smov [#allocation14]   ;;  %s2221_s22 = int_to_ptr.vmem [resolvable:$true] %s280_s22 }
  0x1e   : > { %s2779_s17 = scalar_select %p2207_p3, 1, 0 }
  0x1f   : > { %p1540_p4 = pneg %p2207_p3  ;;  %s2223_s24 = sshll.u32 %s2080_s23, 4  ;;  %s308_s24 = int_to_ptr.vmem [resolvable:$true] %s2223_s24 }
  0x20   : > { %2780 = sst [smem:[#allocation31_spill]] %s2779_s17  ;;  %s2782_s2 = sld [smem:[#allocation34_spill]] }
  0x21   : > { %p2217_p5 = pnand %p1540_p4, %p2760_p1 }
  0x23   : > { %p2233_p7 = pneg %p2217_p5 }
  0x26   : > { %s1706_s18 = scalar_lea.hbm %s2782_s2, 256 }
  0x27   : > { %p1707_p6 = scmp.ne.s32.totalorder %s2782_s2, %s1706_s18  ;;  %p1713_p10 = scmp.lt.u32.totalorder %s1706_s18, %s2782_s2 }
  0x29   : > { %p1709_p8 = pnand %p2233_p7, %p1707_p6 }
  0x2b   : > { %p1710_p9 = pneg %p1709_p8 }
  0x2d   : > { %p1715_p11 = pnand %p1713_p10, %p1710_p9 }
  0x2f   : > { %1718 = shalt.err (!%p1715_p11)
}
  0x30   : > { %s1719_s8 = scalar_lea.vmem %s2211_s19, 256  ;;  %p1727_p2 = scmp.lt.s32.totalorder %s2211_s19, %s2211_s19 }
  0x31   : > { %p1720_p12 = scmp.ne.s32.totalorder %s2211_s19, %s1719_s8  ;;  %p1728_p4 = scmp.lt.s32.totalorder %s1719_s8, %s1719_s8 }
  0x33   : > { %p1722_p13 = pnand %p1720_p12, %p2233_p7  ;;  %p1729_p6 = por %p1728_p4, %p1727_p2 }
  0x35   : > { %p1723_p0 = pneg %p1722_p13 }
  0x37   : > { %p1730_p8 = pnand %p1729_p6, %p1723_p0 }
  0x39   : > { %1733 = shalt.err (!%p1730_p8)
}
  0x3a   : > { %s2762_s12 = smov 128   ;;  %s2082_s25 = smov 8  }
  0x3b   : > { %1543 = dma.hbm_to_vmem [thread:$0]  (!%p2217_p5), %s2782_s2, 256, %s2211_s19, [#allocation9], %s2762_s12, %s2762_s12, %s2082_s25  }
  0x3c   : > { %s2784_s3 = sld [smem:[#allocation35_spill]] }
  0x42   : > { %s1734_s8 = scalar_lea.hbm %s2784_s3, 256 }
  0x43   : > { %p1735_p9 = scmp.ne.s32.totalorder %s2784_s3, %s1734_s8  ;;  %p1741_p12 = scmp.lt.u32.totalorder %s1734_s8, %s2784_s3 }
  0x45   : > { %p1737_p10 = pnand %p1735_p9, %p2233_p7 }
  0x47   : > { %p1738_p11 = pneg %p1737_p10 }
  0x49   : > { %p1743_p13 = pnand %p1741_p12, %p1738_p11 }
  0x4b   : > { %1746 = shalt.err (!%p1743_p13)
}
  0x4c   : > { %s1747_s19 = scalar_lea.vmem %s2221_s22, 256  ;;  %p1755_p6 = scmp.lt.s32.totalorder %s2221_s22, %s2221_s22 }
  0x4d   : > { %p1748_p0 = scmp.ne.s32.totalorder %s2221_s22, %s1747_s19  ;;  %p1756_p8 = scmp.lt.s32.totalorder %s1747_s19, %s1747_s19 }
  0x4f   : > { %p1750_p2 = pnand %p1748_p0, %p2233_p7  ;;  %p1757_p9 = por %p1756_p8, %p1755_p6 }
  0x51   : > { %p1751_p4 = pneg %p1750_p2 }
  0x53   : > { %p1758_p10 = pnand %p1757_p9, %p1751_p4 }
  0x55   : > { %1761 = shalt.err (!%p1758_p10)
}
  0x56   : > { %1546 = dma.hbm_to_vmem [thread:$0]  (!%p2217_p5), %s2784_s3, 256, %s2221_s22, [#allocation12], %s2762_s12, %s2762_s12, %s2082_s25  }
  0x57   : > { %s2785_s5 = sld [smem:[#allocation37_spill]] }
  0x5d   : > { %s1762_s26 = scalar_lea.hbm %s2785_s5, 128 }
  0x5e   : > { %p1763_p11 = scmp.ne.s32.totalorder %s2785_s5, %s1762_s26  ;;  %p1769_p0 = scmp.lt.u32.totalorder %s1762_s26, %s2785_s5 }
  0x60   : > { %p1765_p12 = pnand %p1763_p11, %p2233_p7 }
  0x62   : > { %p1766_p13 = pneg %p1765_p12 }
  0x64   : > { %p1771_p2 = pnand %p1769_p0, %p1766_p13 }
  0x66   : > { %1774 = shalt.err (!%p1771_p2)
}
  0x67   : > { %s1775_s19 = scalar_lea.vmem %s308_s24, 128  ;;  %p1783_p9 = scmp.lt.s32.totalorder %s308_s24, %s308_s24 }
  0x68   : > { %p1776_p4 = scmp.ne.s32.totalorder %s308_s24, %s1775_s19  ;;  %p1784_p10 = scmp.lt.s32.totalorder %s1775_s19, %s1775_s19 }
  0x6a   : > { %p1778_p6 = pnand %p1776_p4, %p2233_p7  ;;  %p1785_p1 = por %p1784_p10, %p1783_p9 }
  0x6c   : > { %p1779_p8 = pneg %p1778_p6 }
  0x6e   : > { %p1786_p3 = pnand %p1785_p1, %p1779_p8 }
  0x70   : > { %1789 = shalt.err (!%p1786_p3)
}
  0x71   : > { %1552 = dma.hbm_to_vmem [thread:$0]  (!%p2217_p5), %s2785_s5, 128, %s308_s24, [#allocation15]  }
  0x72   : > { %s2083_s27 = smov [#allocation13]   ;;  %s2084_s17 = smov [#allocation16]  }
  0x73   : > { %s293_s28 = sshll.u32 %s2083_s27, 4  ;;  %s318_s26 = sshll.u32 %s2084_s17, 4  ;;  %s294_s28 = int_to_ptr.vmem [resolvable:$true] %s293_s28  ;;  %s319_s26 = int_to_ptr.vmem [resolvable:$true] %s318_s26 }
  0x74   : > { %s2786_s4 = sld [smem:[#allocation36_spill]] }
  0x7a   : > { %s1790_s23 = scalar_lea.hbm %s2786_s4, 256 }
  0x7b   : > { %p1791_p1 = scmp.ne.s32.totalorder %s2786_s4, %s1790_s23  ;;  %p1797_p12 = scmp.lt.u32.totalorder %s1790_s23, %s2786_s4 }
  0x7d   : > { %p1793_p3 = pnand %p1791_p1, %p2233_p7 }
  0x7f   : > { %p1794_p11 = pneg %p1793_p3 }
  0x81   : > { %p1799_p13 = pnand %p1797_p12, %p1794_p11 }
  0x83   : > { %1802 = shalt.err (!%p1799_p13)
}
  0x84   : > { %s1803_s24 = scalar_lea.vmem %s294_s28, 256  ;;  %p1811_p6 = scmp.lt.s32.totalorder %s294_s28, %s294_s28 }
  0x85   : > { %p1804_p0 = scmp.ne.s32.totalorder %s294_s28, %s1803_s24  ;;  %p1812_p8 = scmp.lt.s32.totalorder %s1803_s24, %s1803_s24 }
  0x87   : > { %p1806_p2 = pnand %p1804_p0, %p2233_p7  ;;  %p1813_p9 = por %p1812_p8, %p1811_p6 }
  0x89   : > { %p1807_p4 = pneg %p1806_p2 }
  0x8b   : > { %p1814_p10 = pnand %p1813_p9, %p1807_p4 }
  0x8d   : > { %1817 = shalt.err (!%p1814_p10)
}
  0x8e   : > { %s2787_s1 = smov 128   ;;  %s2788_s6 = sld [smem:[#allocation38_spill]] }
  0x8f   : > { %1549 = dma.hbm_to_vmem [thread:$0]  (!%p2217_p5), %s2786_s4, 256, %s294_s28, [#allocation12], %s2787_s1, %s2787_s1, %s2082_s25  }
  0x94   : > { %s1818_s21 = scalar_lea.hbm %s2788_s6, 128 }
  0x95   : > { %p1819_p1 = scmp.ne.s32.totalorder %s2788_s6, %s1818_s21  ;;  %p1825_p12 = scmp.lt.u32.totalorder %s1818_s21, %s2788_s6 }
  0x97   : > { %p1821_p3 = pnand %p1819_p1, %p2233_p7 }
  0x99   : > { %p1822_p11 = pneg %p1821_p3 }
  0x9b   : > { %p1827_p13 = pnand %p1825_p12, %p1822_p11 }
  0x9d   : > { %1830 = shalt.err (!%p1827_p13)
}
  0x9e   : > { %s1831_s24 = scalar_lea.vmem %s319_s26, 128  ;;  %p1839_p6 = scmp.lt.s32.totalorder %s319_s26, %s319_s26 }
  0x9f   : > { %p1832_p0 = scmp.ne.s32.totalorder %s319_s26, %s1831_s24  ;;  %p1840_p8 = scmp.lt.s32.totalorder %s1831_s24, %s1831_s24 }
  0xa1   : > { %p1834_p2 = pnand %p1832_p0, %p2233_p7  ;;  %p1841_p9 = por %p1840_p8, %p1839_p6 }
  0xa3   : > { %p1835_p4 = pneg %p1834_p2 }
  0xa5   : > { %p1842_p10 = pnand %p1841_p9, %p1835_p4 }
  0xa7   : > { %1845 = shalt.err (!%p1842_p10)
}
  0xa8   : > { %1555 = dma.hbm_to_vmem [thread:$0]  (!%p2217_p5), %s2788_s6, 128, %s319_s26, [#allocation15]  }
  0xa9   : > { %s2085_s1 = smov [#allocation17]   ;;  %s1846_s18 = scalar_lea.hbm %s2754_s7, 128 }
  0xaa   : > { %s329_s12 = sshll.u32 %s2085_s1, 4  ;;  %p1847_p1 = scmp.ne.s32.totalorder %s2754_s7, %s1846_s18  ;;  %s330_s12 = int_to_ptr.vmem [resolvable:$true] %s329_s12 }
  0xab   : > { %p1853_p12 = scmp.lt.u32.totalorder %s1846_s18, %s2754_s7 }
  0xac   : > { %p1849_p3 = pnand %p1847_p1, %p2233_p7 }
  0xae   : > { %p1850_p11 = pneg %p1849_p3 }
  0xb0   : > { %p1855_p13 = pnand %p1853_p12, %p1850_p11 }
  0xb2   : > { %1858 = shalt.err (!%p1855_p13)
}
  0xb3   : > { %s1859_s26 = scalar_lea.vmem %s330_s12, 128  ;;  %p1867_p6 = scmp.lt.s32.totalorder %s330_s12, %s330_s12 }
  0xb4   : > { %p1860_p0 = scmp.ne.s32.totalorder %s330_s12, %s1859_s26  ;;  %p1868_p8 = scmp.lt.s32.totalorder %s1859_s26, %s1859_s26 }
  0xb6   : > { %p1862_p2 = pnand %p1860_p0, %p2233_p7  ;;  %p1869_p9 = por %p1868_p8, %p1867_p6 }
  0xb8   : > { %p1863_p4 = pneg %p1862_p2 }
  0xba   : > { %p1870_p10 = pnand %p1869_p9, %p1863_p4 }
  0xbc   : > { %1873 = shalt.err (!%p1870_p10)
}
  0xbd   : > { %1558 = dma.hbm_to_vmem [thread:$0]  (!%p2217_p5), %s2754_s7, 128, %s330_s12, [#allocation18]  }
  0xbe   : > { %s1435_s11 = sadd.s32 4294967294, %s2076_s15   ;;  %s39_s20 = sadd.s32 1, %s2068_s13 }
  0xbf   : > { %p40_p7 = scmp.ge.s32.totalorder %s39_s20, 2  ;;  %s42_s25 = sadd.s32 1, %s2072_s14 }
  0xc0   : > { %s51_s28 = sadd.s32 1, %s2056_s10  ;;  %p58_p1 = scmp.ne.s32.totalorder %s2056_s10, %s2052_s9 }
  0xc1   : > { %s2833_s20 = smov (%p40_p7, %s39_s20), 0  ;;  %s2835_s25 = smov (!%p40_p7, %s42_s25), %s2072_s14 }
  0xc2   : > { %s2370_s1 = ssub.s32 %s2068_s13, %s2833_s20  ;;  %p2764_p5 = scmp.eq.s32.totalorder %s2076_s15, 0 }
  0xc3   : > { %p44_p3 = scmp.ge.s32.totalorder %s2835_s25, 2  ;;  %p64_p11 = scmp.ne.s32.totalorder %s2052_s9, %s2048_s30 }
  0xc4   : > { %p2380_p12 = por %p2764_p5, %p58_p1  ;;  %p2790_p0 = scmp.eq.s32.totalorder %s2202_s16, 0 }
  0xc5   : > { %s2837_s25 = smov (%p44_p3, %s2835_s25), 0  ;;  %p242_p4 = scmp.eq.s32.totalorder %s2202_s16, 3 }
  0xc6   : > { %p2389_p2 = por %p2790_p0, %p64_p11  ;;  %s46_s17 = ssub.s32 %s2072_s14, %s2837_s25 }
  0xc7   : > { %p248_p6 = scmp.eq.s32.totalorder %s1435_s11, 3  ;;  %s48_s18 = sor.u32 %s2370_s1, %s46_s17 }
  0xc8   : > { %p2400_p8 = por %p242_p4, %p58_p1  ;;  %p49_p9 = scmp.eq.s32.totalorder %s48_s18, 0 }
  0xc9   : > { %p2404_p10 = por %p248_p6, %p64_p11  ;;  %p2763_p7 = scmp.lt.s32.totalorder %s2076_s15, 4 }
  0xca   : > { %s2792_s21 = scalar_select %p2400_p8, 1, 0 }
  0xcb   : > { %s2793_s23 = scalar_select %p2404_p10, 1, 0 }
  0xcc   : > { %s340_s8 = sand.u32 1, %s2056_s10   ;;  %s1445_s22 = sshll.u32 %s2068_s13, 3 }
  0xcd   : > { %s2411_s19 = scalar_select %p49_p9, %s2056_s10, %s51_s28  }
  0xce   : > { %s1444_s26 = sshll.u32 %s340_s8, 5  ;;  %s1446_s24 = sshll.u32 %s2072_s14, 4 }
  0xcf   : > { %s344_s11 = scalar_lea.vmem [#allocation5], %s1444_s26  ;;  %s350_s17 = sadd.s32 %s1446_s24, %s1445_s22 }
  0xd0   : > { %s353_s2 = sshll.u32 %s344_s11, 4  ;;  %s1447_s3 = sshll.u32 %s350_s17, 6  ;;  %s2415_s2 = int_to_ptr.vmem [resolvable:$true] %s353_s2 }
  0xd1   : > { %p2421_p1 = pnand %p2763_p7, %p2380_p12  ;;  %s2795_s0 = sld [smem:[#allocation32_spill]] }
  0xd2   : > { %s2430_s26 = scalar_lea.sflag [#allocation6], %s340_s8 }
  0xd3   : > { %p1876_p11 = pneg %p2421_p1 }
  0xd7   : > { %s2428_s28 = scalar_lea.hbm %s2795_s0, %s1447_s3  ;;  %s1879_s5 = scalar_lea.hbm %s2795_s0, 2048 }
  0xd8   : > { %s1874_s22 = scalar_lea.hbm %s2428_s28, 512  ;;  %p1880_p4 = scmp.lt.u32.totalorder %s2428_s28, %s2795_s0 }
  0xd9   : > { %p1875_p3 = scmp.ne.s32.totalorder %s2428_s28, %s1874_s22  ;;  %p1881_p6 = scmp.lt.u32.totalorder %s1879_s5, %s1874_s22 }
  0xda   : > { %p1883_p7 = scmp.lt.u32.totalorder %s1874_s22, %s2428_s28 }
  0xdb   : > { %p1877_p12 = pnand %p1876_p11, %p1875_p3  ;;  %p1882_p9 = por %p1881_p6, %p1880_p4 }
  0xdd   : > { %p1878_p0 = pneg %p1877_p12  ;;  %p1884_p5 = por %p1883_p7, %p1882_p9 }
  0xdf   : > { %p1885_p13 = pnand %p1884_p5, %p1878_p0 }
  0xe1   : > { %1888 = shalt.err (!%p1885_p13)
}
  0xe2   : > { %s1889_s8 = scalar_lea.vmem %s2415_s2, 512  ;;  %s2086_s11 = smov [#allocation5]  }
  0xe3   : > { %p1890_p3 = scmp.ne.s32.totalorder %s2415_s2, %s1889_s8  ;;  %s1894_s17 = sshll.u32 %s2086_s11, 4  ;;  %s1895_s17 = int_to_ptr.vmem [resolvable:$false] %s1894_s17 }
  0xe4   : > { %s1896_s12 = scalar_lea.vmem %s1895_s17, 1024  ;;  %p1897_p8 = scmp.lt.s32.totalorder %s2415_s2, %s1895_s17 }
  0xe5   : > { %p1892_p12 = pnand %p1890_p3, %p1876_p11  ;;  %p1898_p4 = scmp.lt.s32.totalorder %s1896_s12, %s1889_s8 }
  0xe7   : > { %p1893_p10 = pneg %p1892_p12  ;;  %p1899_p6 = por %p1898_p4, %p1897_p8 }
  0xe9   : > { %p1900_p7 = pnand %p1899_p6, %p1893_p10 }
  0xeb   : > { %1903 = shalt.err (!%p1900_p7)
}
  0xec   : > { %s2087_s22 = smov 256   ;;  %s2796_s4 = sld [smem:[#allocation28_spill]] }
  0xed   : > { %s2797_s5 = sld [smem:[#allocation27_spill]]  ;;  %s2088_s3 = smov 16  }
  0xee   : > { %1562 = dma.hbm_to_vmem [thread:$0]  (!%p2421_p1), %s2428_s28, 512, %s2415_s2, %s2430_s26, %s2087_s22, %s2087_s22, %s2088_s3  }
  0xef   : > { %s77_s24 = sadd.s32 1, %s2044_s29  ;;  %p2798_p13 = scmp.eq.s32.totalorder %s2370_s1, 0 }
  0xf0   : > { %p2799_p8 = scmp.eq.s32.totalorder %s2076_s15, 0  ;;  %s363_s11 = sand.u32 1, %s2076_s15  }
  0xf1   : > { %s2464_s8 = scalar_select %p2798_p13, %s2044_s29, %s77_s24  }
  0xf2   : > { %p84_p5 = scmp.ne.s32.totalorder %s2044_s29, %s2796_s4  ;;  %s365_s17 = sand.u32 1, %s2044_s29  }
  0xf3   : > { %p90_p11 = scmp.ne.s32.totalorder %s2796_s4, %s2797_s5  ;;  %p2800_p0 = scmp.eq.s32.totalorder %s2202_s16, 0 }
  0xf4   : > { %p86_p10 = por %p84_p5, %p2799_p8  ;;  %s1507_s0 = smul.u32 3, %s365_s17 }
  0xf5   : > { %p2474_p9 = por %p90_p11, %p2800_p0  ;;  %p2802_p3 = scmp.lt.s32.totalorder %s2076_s15, 4 }
  0xf6   : > { %s1508_s2 = smul.u32 48, %s2068_s13  ;;  %s2804_s26 = sld [smem:[#allocation33_spill]] }
  0xf7   : > { %s2801_s12 = scalar_select %p2474_p9, 1, 0 }
  0xf8   : > { %p2480_p12 = pnand %p2802_p3, %p86_p10  ;;  %s367_s4 = scalar_lea.vmem [#allocation8], %s1507_s0 }
  0xf9   : > { %s375_s5 = sshll.u32 %s367_s4, 4  ;;  %s364_s3 = scalar_lea.sflag [#allocation9], %s363_s11  ;;  %s2490_s5 = int_to_ptr.vmem [resolvable:$true] %s375_s5 }
  0xfa   : > { %p1906_p4 = pneg %p2480_p12 }
  0xfc   : > { %s2488_s22 = scalar_lea.hbm %s2804_s26, %s1508_s2  ;;  %s1909_s1 = scalar_lea.hbm %s2804_s26, 96 }
  0xfd   : > { %s1904_s24 = scalar_lea.hbm %s2488_s22, 48  ;;  %p1910_p5 = scmp.lt.u32.totalorder %s2488_s22, %s2804_s26 }
  0xfe   : > { %p1905_p1 = scmp.ne.s32.totalorder %s2488_s22, %s1904_s24  ;;  %p1911_p13 = scmp.lt.u32.totalorder %s1909_s1, %s1904_s24 }
  0xff   : > { %p1913_p10 = scmp.lt.u32.totalorder %s1904_s24, %s2488_s22 }
 0x100   : > { %p1907_p6 = pnand %p1906_p4, %p1905_p1  ;;  %p1912_p8 = por %p1911_p13, %p1910_p5 }
 0x102   : > { %p1908_p7 = pneg %p1907_p6  ;;  %p1914_p11 = por %p1913_p10, %p1912_p8 }
 0x104   : > { %p1915_p0 = pnand %p1914_p11, %p1908_p7 }
 0x106   : > { %1918 = shalt.err (!%p1915_p0)
}
 0x107   : > { %s1919_s0 = scalar_lea.vmem %s2490_s5, 48  ;;  %s2089_s11 = smov [#allocation8]  }
 0x108   : > { %p1920_p3 = scmp.ne.s32.totalorder %s2490_s5, %s1919_s0  ;;  %s1924_s4 = sshll.u32 %s2089_s11, 4  ;;  %s1925_s4 = int_to_ptr.vmem [resolvable:$false] %s1924_s4 }
 0x109   : > { %s1926_s6 = scalar_lea.vmem %s1925_s4, 96  ;;  %p1927_p9 = scmp.lt.s32.totalorder %s2490_s5, %s1925_s4 }
 0x10a   : > { %p1922_p1 = pnand %p1920_p3, %p1906_p4  ;;  %p1928_p5 = scmp.lt.s32.totalorder %s1926_s6, %s1919_s0 }
 0x10c   : > { %p1923_p6 = pneg %p1922_p1  ;;  %p1929_p13 = por %p1928_p5, %p1927_p9 }
 0x10e   : > { %p1930_p8 = pnand %p1929_p13, %p1923_p6 }
 0x110   : > { %1933 = shalt.err (!%p1930_p8)
}
 0x111   : > { %1565 = dma.hbm_to_vmem [thread:$0]  (!%p2480_p12), %s2488_s22, 48, %s2490_s5, %s364_s3  }
 0x112   : > { %s2805_s24 = sld [smem:[#allocation31_spill]] }
 0x118   : > { %p2806_p7 = scmp.ne.s32.totalorder %s2805_s24, 0 }
 0x119   : > { %s2520_s17 = sand.u32 (!%p2806_p7), 1, %s2052_s9  }
 0x11a   : > { %384 = sbr.rel (%p2806_p7) target bundleno = 1117 (0x45d), region = 52  ;;  %s1450_s2 = sshll.u32 (!%p2806_p7), %s2520_s17, 5 }
 0x11b   : > { %s387_s1 = scalar_lea.sflag (!%p2806_p7), [#allocation6], %s2520_s17  ;;  %s2524_s28 = scalar_lea.vmem (!%p2806_p7), [#allocation5], %s1450_s2 }
 0x121   : > { %2007 = dma.done.wait (%p2389_p2), %s387_s1, 512  }
 0x122   : > { %2009 = vsyncadd (%p2389_p2), %s387_s1, 4294966784  ;;  %s2807_s18 = sld [smem:[#allocation28_spill]]  ;;  %s395_s22 = sand.u32 1, %s2202_s16  }
 0x123   : > { %s396_s0 = scalar_lea.sflag [#allocation9], %s395_s22  ;;  %p2808_p9 = scmp.ne.s32.totalorder %s2801_s12, 0 }
 0x128   : > { %s397_s5 = sand.u32 1, %s2807_s18  }
 0x129   : > { %s2532_s3 = smul.u32 3, %s397_s5 }
 0x12b   : > { %s399_s11 = scalar_lea.vmem [#allocation8], %s2532_s3 }
 0x12c   : > { %2011 = dma.done.wait (%p2808_p9), %s396_s0, 48  }
 0x12d   : > { %2013 = vsyncadd (%p2808_p9), %s396_s0, 4294967248  ;;  %p2809_p12 = scmp.eq.s32.totalorder %s2202_s16, 0 }
 0x12f   : > { %2015 = dma.done.wait (%p2809_p12), [#allocation9], 256   ;;  %p2810_p2 = pmov %p2809_p12 }
 0x131   : > { %2017 = vsyncadd (%p2810_p2), [#allocation9], 4294967040  ;;  %p2811_p4 = pmov %p2810_p2 }
 0x132   : > { %p2812_p10 = pmov %p2810_p2 }
 0x133   : > { %2019 = dma.done.wait (%p2811_p4), [#allocation12], 512  }
 0x134   : > { %2021 = vsyncadd (%p2812_p10), [#allocation12], 4294966784  ;;  %p2813_p11 = pmov %p2810_p2 }
 0x135   : > { %p2814_p0 = pmov %p2810_p2 }
 0x136   : > { %2023 = dma.done.wait (%p2813_p11), [#allocation15], 256  }
 0x137   : > { %2025 = vsyncadd (%p2814_p0), [#allocation15], 4294967040  ;;  %p2815_p3 = pmov %p2814_p0 }
 0x138   : > { %p2816_p1 = pmov %p2814_p0 }
 0x139   : > { %2027 = dma.done.wait (%p2815_p3), [#allocation18], 128  }
 0x13a   : > { %2029 = vsyncadd (%p2816_p1), [#allocation18], 4294967168  ;;  %v2090_v0 = vmov 0   ;;  %v1694_v1 = vld [vmem:[%s2524_s28 + $0x4] ss:$16 sps:$4 sm:$0xff]   ;;  %s2091_s27 = smov 127  }
 0x13b   : > { %875 = vmatprep.subr.bf16.mxu1 %v2090_v0  ;;  %1693 = vset.pattern.permute.xlu1 %v2090_v0  ;;  %v1696_v2 = vld [vmem:[%s2524_s28] ss:$16 sps:$4 sm:$0xff]   ;;  %v1697_v3 = vld [vmem:[%s2524_s28 + $0x8] ss:$16 sps:$4 sm:$0xff]   ;;  %v1699_v4 = vld [vmem:[%s2524_s28 + $0xc] ss:$16 sps:$4 sm:$0xff]  }
 0x13c   : > { %1692 = vset.pattern.permute.xlu0 %v2090_v0  ;;  %832 = vmatprep.subr.bf16.mxu0 %v1694_v1  ;;  %v1700_v5 = vld [vmem:[%s2524_s28 + $0x8] ss:$16 sps:$4 sm:$0xff]   ;;  %s2092_s16 = smov 126   ;;  %s2093_s12 = smov 108   ;;  %vm828_vm0 = vcmask 130048   ;;  %v917_v8 = vld [vmem:[#allocation11 + $0x8] sm:$0xff] }
 0x13d   : > { %508 = vrot.lane.b32.xlu0 %v1694_v1, %s2091_s27  ;;  %506 = vrot.lane.b32.xlu1 %v1696_v2, %s2091_s27  ;;  %s2094_s4 = smov 107   ;;  %s2095_s6 = smov 106   ;;  %v1703_v6 = vld [vmem:[#allocation10 + $0x4] ss:$8 sps:$4 sm:$0xff]   ;;  %v916_v7 = vld [vmem:[#allocation11] sm:$0xff]  ;;  %vm514_vm1 = vcmask 1039360  }
 0x13e   : > { %833 = vmatpush1.bf16.msra.mxu0 %v1696_v2  ;;  %876 = vmatpush1.bf16.msra.mxu1 %v1700_v5  ;;  %s2096_s24 = smov 88   ;;  %s2097_s2 = smov 87   ;;  %v935_v9 = vld [vmem:[#allocation13 + $0x8] sm:$0xff]  ;;  %v934_v10 = vld [vmem:[#allocation13] sm:$0xff]  ;;  %vm552_vm2 = vcmask 1031168   ;;  %vm590_vm3 = vcmask 883712  }
 0x13f   : > { %877 = vmatprep.subr.bf16.mxu1 %v2090_v0  ;;  %1495 = vmatprep.mubr.msk.bf16.mxu0 %vm828_vm0, %v1703_v6  ;;  %s2098_s1 = smov 86   ;;  %vm628_vm4 = vcmask 875520   ;;  %vm666_vm5 = vcmask 867328   ;;  %vm704_vm6 = vcmask 719872   ;;  %vm742_vm7 = vcmask 711680   ;;  %s2817_s28 = sld [smem:[#allocation29_spill]] }
 0x140   : > { %1496 = vmatprep.mubr.msk.bf16.mxu1 %vm828_vm0, %v1703_v6  ;;  %vm780_vm8 = vcmask 703488   ;;  %v2099_v5 = vmov 1966171168   ;;  %s2818_s18 = sld [smem:[#allocation30_spill]]  ;;  %s1457_s22 = sshll.u32 %s2520_s17, 4 }
 0x141   : > { %510 = vrot.lane.b32.xlu0 %v1697_v3, %s2091_s27  ;;  %512 = vrot.lane.b32.xlu1 %v1699_v4, %s2091_s27  ;;  %v972_v6 = vunpack.c.l.s4 %v2099_v5  ;;  %p2820_p5 = scmp.ne.s32.totalorder %s2792_s21, 0 }
 0x145   : > { %546 = vrot.lane.b32.xlu0 %v1694_v1, %s2092_s16  ;;  %548 = vrot.lane.b32.xlu1 %v1697_v3, %s2092_s16  ;;  %s1502_s5 = sshll.u32 %s2817_s28, 1  ;;  %s2100_s28 = smov [#allocation19]  }
 0x146   : > { %s1503_s3 = sshll.u32 %s2818_s18, 2  ;;  %s1938_s18 = sshll.u32 %s2100_s28, 4  ;;  %s1939_s18 = int_to_ptr.vmem [resolvable:$false] %s1938_s18 }
 0x147   : > { %s1263_s0 = sadd.s32 %s1503_s3, %s1502_s5 }
 0x149   : > { %544 = vrot.lane.b32.xlu0 %v1696_v2, %s2092_s16  ;;  %550 = vrot.lane.b32.xlu1 %v1699_v4, %s2092_s16 }
 0x14d   : > { %584 = vrot.lane.b32.xlu0 %v1694_v1, %s2093_s12  ;;  %586 = vrot.lane.b32.xlu1 %v1697_v3, %s2093_s12 }
 0x151   : > { %582 = vrot.lane.b32.xlu0 %v1696_v2, %s2093_s12  ;;  %588 = vrot.lane.b32.xlu1 %v1699_v4, %s2093_s12 }
 0x155   : > { %622 = vrot.lane.b32.xlu0 %v1694_v1, %s2094_s4  ;;  %624 = vrot.lane.b32.xlu1 %v1697_v3, %s2094_s4 }
 0x159   : > { %620 = vrot.lane.b32.xlu0 %v1696_v2, %s2094_s4  ;;  %626 = vrot.lane.b32.xlu1 %v1699_v4, %s2094_s4 }
 0x15d   : > { %660 = vrot.lane.b32.xlu0 %v1694_v1, %s2095_s6  ;;  %662 = vrot.lane.b32.xlu1 %v1697_v3, %s2095_s6 }
 0x161   : > { %658 = vrot.lane.b32.xlu0 %v1696_v2, %s2095_s6  ;;  %664 = vrot.lane.b32.xlu1 %v1699_v4, %s2095_s6 }
 0x165   : > { %698 = vrot.lane.b32.xlu0 %v1694_v1, %s2096_s24  ;;  %700 = vrot.lane.b32.xlu1 %v1697_v3, %s2096_s24 }
 0x169   : > { %696 = vrot.lane.b32.xlu0 %v1696_v2, %s2096_s24  ;;  %702 = vrot.lane.b32.xlu1 %v1699_v4, %s2096_s24 }
 0x16d   : > { %736 = vrot.lane.b32.xlu0 %v1694_v1, %s2097_s2  ;;  %738 = vrot.lane.b32.xlu1 %v1697_v3, %s2097_s2 }
 0x171   : > { %734 = vrot.lane.b32.xlu0 %v1696_v2, %s2097_s2  ;;  %740 = vrot.lane.b32.xlu1 %v1699_v4, %s2097_s2 }
 0x175   : > { %774 = vrot.lane.b32.xlu0 %v1694_v1, %s2098_s1  ;;  %776 = vrot.lane.b32.xlu1 %v1697_v3, %s2098_s1  ;;  %v1701_v3 = vld [vmem:[#allocation10] ss:$8 sps:$4 sm:$0xff]  }
 0x179   : > { %772 = vrot.lane.b32.xlu0 %v1696_v2, %s2098_s1  ;;  %778 = vrot.lane.b32.xlu1 %v1699_v4, %s2098_s1 }
 0x17d   : > { %920 = vperm.xlu0 %1692, %v916_v7   ;;  %925 = vperm.xlu1 %1693, %v917_v8   ;;  %v974_v7 = vlaneseq }
 0x17f   : > { %v975_v8 = vshrl.u32 %v974_v7, 7 }
 0x181   : > { %943 = vperm.xlu0 %1692, %v935_v9   ;;  %938 = vperm.xlu1 %1693, %v934_v10   ;;  %v1497_v10 = vld.sshfl [vmem:[%s399_s11] sm:$0x13 pattern:$0x75316420]  ;;  %s1504_s11 = sshll.u32 %s1263_s0, 7 }
 0x1af   : > { %v509_v11 = vpop.permute.xlu0 %508  ;;  %v507_v12 = vpop.permute.xlu1 %506 }
 0x1b0   : > { %v515_v17 = vsel %vm514_vm1, %v507_v12, %v509_v11 }
 0x1b3   : > { %v511_v13 = vpop.permute.xlu0 %510  ;;  %v513_v14 = vpop.permute.xlu1 %512 }
 0x1b4   : > { %v516_v15 = vsel %vm514_vm1, %v509_v11, %v511_v13  ;;  %v517_v16 = vsel %vm514_vm1, %v511_v13, %v513_v14  ;;  %v970_v13 = vcombine.high %v1497_v10, %v1497_v10 }
 0x1b5   : > { %834 = vmatprep.subr.bf16.mxu0 %v516_v15  ;;  %878 = vmatpush1.bf16.msra.mxu1 %v517_v16 }
 0x1b6   : > { %835 = vmatpush1.bf16.msra.mxu0 %v515_v17  ;;  %879 = vmatprep.subr.bf16.mxu1 %v2090_v0 }
 0x1b7   : > { %v547_v18 = vpop.permute.xlu0 %546  ;;  %v549_v19 = vpop.permute.xlu1 %548 }
 0x1b8   : > { %v554_v20 = vsel %vm552_vm2, %v547_v18, %v549_v19 }
 0x1b9   : > { %836 = vmatprep.subr.bf16.mxu0 %v554_v20 }
 0x1bb   : > { %v545_v21 = vpop.permute.xlu0 %544  ;;  %v551_v22 = vpop.permute.xlu1 %550 }
 0x1bc   : > { %v553_v23 = vsel %vm552_vm2, %v545_v21, %v547_v18  ;;  %v555_v24 = vsel %vm552_vm2, %v549_v19, %v551_v22 }
 0x1bd   : > { %837 = vmatpush1.bf16.msra.mxu0 %v553_v23  ;;  %880 = vmatpush1.bf16.msra.mxu1 %v555_v24 }
 0x1be   : > { %881 = vmatprep.subr.bf16.mxu1 %v2090_v0 }
 0x1bf   : > { %v585_v25 = vpop.permute.xlu0 %584  ;;  %v587_v26 = vpop.permute.xlu1 %586 }
 0x1c0   : > { %v592_v27 = vsel %vm590_vm3, %v585_v25, %v587_v26 }
 0x1c1   : > { %838 = vmatprep.subr.bf16.mxu0 %v592_v27 }
 0x1c3   : > { %v583_v28 = vpop.permute.xlu0 %582  ;;  %v589_v29 = vpop.permute.xlu1 %588 }
 0x1c4   : > { %v591_v30 = vsel %vm590_vm3, %v583_v28, %v585_v25  ;;  %v593_v31 = vsel %vm590_vm3, %v587_v26, %v589_v29  ;;  %v991_v26 = vsub.s32 0, %v975_v8 }
 0x1c5   : > { %839 = vmatpush1.bf16.msra.mxu0 %v591_v30  ;;  %882 = vmatpush1.bf16.msra.mxu1 %v593_v31 }
 0x1c6   : > { %883 = vmatprep.subr.bf16.mxu1 %v2090_v0 }
 0x1c7   : > { %v623_v32 = vpop.permute.xlu0 %622  ;;  %v625_v33 = vpop.permute.xlu1 %624 }
 0x1c8   : > { %v630_v34 = vsel %vm628_vm4, %v623_v32, %v625_v33 }
 0x1c9   : > { %840 = vmatprep.subr.bf16.mxu0 %v630_v34 }
 0x1cb   : > { %v621_v35 = vpop.permute.xlu0 %620  ;;  %v627_v36 = vpop.permute.xlu1 %626 }
 0x1cc   : > { %v629_v37 = vsel %vm628_vm4, %v621_v35, %v623_v32  ;;  %v631_v38 = vsel %vm628_vm4, %v625_v33, %v627_v36 }
 0x1cd   : > { %841 = vmatpush1.bf16.msra.mxu0 %v629_v37  ;;  %884 = vmatpush1.bf16.msra.mxu1 %v631_v38 }
 0x1ce   : > { %885 = vmatprep.subr.bf16.mxu1 %v2090_v0 }
 0x1cf   : > { %v661_v39 = vpop.permute.xlu0 %660  ;;  %v663_v40 = vpop.permute.xlu1 %662 }
 0x1d0   : > { %v668_v41 = vsel %vm666_vm5, %v661_v39, %v663_v40 }
 0x1d1   : > { %842 = vmatprep.subr.bf16.mxu0 %v668_v41 }
 0x1d3   : > { %v659_v42 = vpop.permute.xlu0 %658  ;;  %v665_v43 = vpop.permute.xlu1 %664 }
 0x1d4   : > { %v667_v44 = vsel %vm666_vm5, %v659_v42, %v661_v39  ;;  %v669_v45 = vsel %vm666_vm5, %v663_v40, %v665_v43 }
 0x1d5   : > { %843 = vmatpush1.bf16.msra.mxu0 %v667_v44  ;;  %886 = vmatpush1.bf16.msra.mxu1 %v669_v45 }
 0x1d6   : > { %887 = vmatprep.subr.bf16.mxu1 %v2090_v0 }
 0x1d7   : > { %v699_v46 = vpop.permute.xlu0 %698  ;;  %v701_v47 = vpop.permute.xlu1 %700 }
 0x1d8   : > { %v706_v48 = vsel %vm704_vm6, %v699_v46, %v701_v47 }
 0x1d9   : > { %844 = vmatprep.subr.bf16.mxu0 %v706_v48 }
 0x1db   : > { %v697_v49 = vpop.permute.xlu0 %696  ;;  %v703_v50 = vpop.permute.xlu1 %702 }
 0x1dc   : > { %v705_v51 = vsel %vm704_vm6, %v697_v49, %v699_v46  ;;  %v707_v52 = vsel %vm704_vm6, %v701_v47, %v703_v50 }
 0x1dd   : > { %845 = vmatpush1.bf16.msra.mxu0 %v705_v51  ;;  %888 = vmatpush1.bf16.msra.mxu1 %v707_v52 }
 0x1de   : > { %889 = vmatprep.subr.bf16.mxu1 %v2090_v0 }
 0x1df   : > { %v737_v53 = vpop.permute.xlu0 %736  ;;  %v739_v54 = vpop.permute.xlu1 %738 }
 0x1e0   : > { %v744_v55 = vsel %vm742_vm7, %v737_v53, %v739_v54 }
 0x1e1   : > { %846 = vmatprep.subr.bf16.mxu0 %v744_v55 }
 0x1e3   : > { %v735_v56 = vpop.permute.xlu0 %734  ;;  %v741_v57 = vpop.permute.xlu1 %740 }
 0x1e4   : > { %v743_v58 = vsel %vm742_vm7, %v735_v56, %v737_v53  ;;  %v745_v59 = vsel %vm742_vm7, %v739_v54, %v741_v57 }
 0x1e5   : > { %847 = vmatpush1.bf16.msra.mxu0 %v743_v58  ;;  %890 = vmatpush1.bf16.msra.mxu1 %v745_v59  ;;  %v2649_v58 = vld [vmem:[#allocation14] sm:$0xff] }
 0x1e6   : > { %891 = vmatprep.subr.bf16.mxu1 %v2090_v0  ;;  %v973_v0 = vunpack.c.0.s8 %v972_v6  ;;  %v1499_v59 = vcombine.high %v2649_v58, %v2649_v58 }
 0x1e7   : > { %v775_v60 = vpop.permute.xlu0 %774  ;;  %v777_v61 = vpop.permute.xlu1 %776 }
 0x1e8   : > { %v782_v62 = vsel %vm780_vm8, %v775_v60, %v777_v61  ;;  %v976_v9 = vsub.s32 %v973_v0, %v975_v8 }
 0x1e9   : > { %848 = vmatprep.subr.bf16.mxu0 %v782_v62 }
 0x1ea   : > { %v977_v12 = vrot.slane %v1497_v10, %v976_v9  ;;  %v984_v16 = vrot.slane %v970_v13, %v976_v9 }
 0x1eb   : > { %v773_v63 = vpop.permute.xlu0 %772  ;;  %v779_v1 = vpop.permute.xlu1 %778 }
 0x1ec   : > { %v781_v2 = vsel %vm780_vm8, %v773_v63, %v775_v60  ;;  %v783_v4 = vsel %vm780_vm8, %v777_v61, %v779_v1  ;;  %v985_v15 = vcombine.high %v977_v12, %v977_v12  ;;  %v994_v32 = vpack.i.b16 %v984_v16, %v984_v16  ;;  %v1238_v60 = vld [vmem:[#allocation17] sm:$0xff]  ;;  %v1230_v61 = vld [vmem:[#allocation16] sm:$0xff] }
 0x1ed   : > { %849 = vmatpush1.bf16.msra.mxu0 %v781_v2  ;;  %892 = vmatpush1.bf16.msra.mxu1 %v783_v4  ;;  %v987_v40 = vpack.i.b16 %v977_v12, %v977_v12 }
 0x1ee   : > { %v1001_v30 = vpack.i.b16 %v985_v15, %v985_v15  ;;  %v999_v46 = vrot.slane %v994_v32, %v991_v26 }
 0x1ef   : > { %v992_v52 = vrot.slane %v987_v40, %v991_v26 }
 0x1f0   : > { %865 = vmatmul.mubr.bf16.vlgmr.msra.gmra.mrb[0].mxu0 %v1701_v3  ;;  %908 = vmatmul.mubr.bf16.vlgmr.msra.gmra.mrb[0].mxu1 %v1701_v3  ;;  %v1006_v45 = vrot.slane %v1001_v30, %v991_v26 }
 0x1f1   : > { %1500 = vmatprep.mubr.msk.bf16.mxu0 %vm828_vm0, %v1499_v59 }
 0x1fc   : > { %v926_v11 = vpop.permute.xlu1 %925  ;;  %v921_v14 = vpop.permute.xlu0 %920 }
 0x200   : > { %v939_v17 = vpop.permute.xlu1 %938  ;;  %v944_v33 = vpop.permute.xlu0 %943 }
 0x2c3   : > { %v866_v18 = vpop.f32.mrb[0].mxu0  ;;  %v909_v20 = vpop.f32.mrb[0].mxu1 }
 0x2c4   : > { %v928_v19 = vmul.f32 %v921_v14, %v866_v18  ;;  %v868_v21 = vpop.f32.mrb[1].mxu0  ;;  %v930_v22 = vmul.f32 %v921_v14, %v909_v20  ;;  %v911_v24 = vpop.f32.mrb[1].mxu1 }
 0x2c5   : > { %v929_v23 = vmul.f32 %v921_v14, %v868_v21  ;;  %v870_v25 = vpop.f32.mrb[2].mxu0  ;;  %v912_v29 = vpop.f32.mrb[2].mxu1 }
 0x2c6   : > { %v946_v27 = vadd.f32 %v939_v17, %v928_v19  ;;  %v931_v28 = vmul.f32 %v926_v11, %v870_v25  ;;  %v872_v31 = vpop.f32.mrb[3].mxu0  ;;  %v948_v34 = vadd.f32 %v939_v17, %v930_v22  ;;  %v933_v36 = vmul.f32 %v926_v11, %v912_v29  ;;  %v914_v38 = vpop.f32.mrb[3].mxu1 }
 0x2c7   : > { %v947_v35 = vadd.f32 %v939_v17, %v929_v23  ;;  %v932_v37 = vmul.f32 %v926_v11, %v872_v31  ;;  %v1498_v38 = vcombine.low %v2649_v58, %v2649_v58 }
 0x2c8   : > { %v949_v39 = vadd.f32 %v944_v33, %v931_v28  ;;  %v951_v41 = vadd.f32 %v944_v33, %v933_v36  ;;  %v952_v43 = vmax.f32 %v946_v27, 0.0  ;;  %v954_v47 = vmax.f32 %v948_v34, 0.0 }
 0x2c9   : > { %v950_v42 = vadd.f32 %v944_v33, %v932_v37  ;;  %v953_v48 = vmax.f32 %v947_v35, 0.0 }
 0x2ca   : > { %v955_v44 = vmax.f32 %v949_v39, 0.0  ;;  %v957_v49 = vmax.f32 %v951_v41, 0.0 }
 0x2cb   : > { %v956_v50 = vmax.f32 %v950_v42, 0.0 }
 0x2cc   : > { %v958_v51 = vpack.c.bf16 %v955_v44, %v952_v43  ;;  %v960_v53 = vpack.c.bf16 %v957_v49, %v954_v47 }
 0x2cd   : > { %v959_v54 = vpack.c.bf16 %v956_v50, %v953_v48 }
 0x2ce   : > { %v1009_v55 = vmul.bf16 %v1006_v45, %v960_v53  ;;  %v1007_v57 = vmul.bf16 %v992_v52, %v958_v51 }
 0x2cf   : > { %v1008_v56 = vmul.bf16 %v999_v46, %v959_v54 }
 0x2d0   : > { %1045 = vrot.lane.b32.xlu1 %v1009_v55, %s2092_s16  ;;  %1027 = vrot.lane.b32.xlu0 %v1009_v55, %s2091_s27 }
 0x2d1   : > { %1189 = vmatprep.subr.bf16.mxu0 %v1008_v56 }
 0x2d2   : > { %1190 = vmatpush1.bf16.msra.mxu0 %v1007_v57 }
 0x2d4   : > { %1081 = vrot.lane.b32.xlu1 %v1009_v55, %s2094_s4  ;;  %1063 = vrot.lane.b32.xlu0 %v1009_v55, %s2093_s12 }
 0x2d8   : > { %1041 = vrot.lane.b32.xlu0 %v1007_v57, %s2092_s16  ;;  %1023 = vrot.lane.b32.xlu1 %v1007_v57, %s2091_s27 }
 0x2dc   : > { %1077 = vrot.lane.b32.xlu0 %v1007_v57, %s2094_s4  ;;  %1059 = vrot.lane.b32.xlu1 %v1007_v57, %s2093_s12 }
 0x2e0   : > { %1043 = vrot.lane.b32.xlu0 %v1008_v56, %s2092_s16  ;;  %1025 = vrot.lane.b32.xlu1 %v1008_v56, %s2091_s27  ;;  %s460_s27 = scalar_lea.vmem [#allocation19], %s1457_s22  ;;  %s1940_s22 = scalar_lea.vmem %s1939_s18, 512 }
 0x2e1   : > { %s1267_s16 = sshll.u32 %s460_s27, 4  ;;  %s2686_s16 = int_to_ptr.vmem [resolvable:$true] %s1267_s16 }
 0x2e2   : > { %p1941_p7 = scmp.lt.s32.totalorder %s2686_s16, %s1939_s18 }
 0x2e4   : > { %1099 = vrot.lane.b32.xlu0 %v1009_v55, %s2095_s6  ;;  %1095 = vrot.lane.b32.xlu1 %v1007_v57, %s2095_s6 }
 0x2e8   : > { %1079 = vrot.lane.b32.xlu0 %v1008_v56, %s2094_s4  ;;  %1061 = vrot.lane.b32.xlu1 %v1008_v56, %s2093_s12 }
 0x2ec   : > { %1113 = vrot.lane.b32.xlu0 %v1007_v57, %s2096_s24  ;;  %1117 = vrot.lane.b32.xlu1 %v1009_v55, %s2096_s24 }
 0x2f0   : > { %1115 = vrot.lane.b32.xlu0 %v1008_v56, %s2096_s24  ;;  %1097 = vrot.lane.b32.xlu1 %v1008_v56, %s2095_s6  ;;  %s2819_s6 = sld [smem:[#allocation39_spill]] }
 0x2f4   : > { %1135 = vrot.lane.b32.xlu0 %v1009_v55, %s2097_s2  ;;  %1131 = vrot.lane.b32.xlu1 %v1007_v57, %s2097_s2 }
 0x2f6   : > { %s2684_s24 = scalar_lea.hbm %s2819_s6, %s1504_s11 }
 0x2f8   : > { %1151 = vrot.lane.b32.xlu0 %v1008_v56, %s2098_s1  ;;  %1133 = vrot.lane.b32.xlu1 %v1008_v56, %s2097_s2  ;;  %s1251_s2 = scalar_lea.sflag [#allocation7], %s2520_s17 }
 0x2fc   : > { %1149 = vrot.lane.b32.xlu0 %v1007_v57, %s2098_s1  ;;  %1153 = vrot.lane.b32.xlu1 %v1009_v55, %s2098_s1  ;;  %s1934_s1 = scalar_lea.vmem %s2686_s16, 256 }
 0x2fd   : > { %p1935_p6 = scmp.ne.s32.totalorder %s2686_s16, %s1934_s1  ;;  %p1942_p9 = scmp.lt.s32.totalorder %s1940_s22, %s1934_s1 }
 0x2ff   : > { %p1936_p13 = pnand %p1935_p6, %p2820_p5  ;;  %p1943_p12 = por %p1942_p9, %p1941_p7 }
 0x300   : > { %1241 = vperm.xlu0 %1692, %v1238_v60   ;;  %1233 = vperm.xlu1 %1693, %v1230_v61  }
 0x301   : > { %p1937_p8 = pneg %p1936_p13 }
 0x303   : > { %p1944_p2 = pnand %p1943_p12, %p1937_p8 }
 0x342   : > { %v1046_v62 = vpop.permute.xlu1 %1045  ;;  %v1028_v63 = vpop.permute.xlu0 %1027 }
 0x346   : > { %v1082_v1 = vpop.permute.xlu1 %1081  ;;  %v1064_v2 = vpop.permute.xlu0 %1063 }
 0x34a   : > { %v1042_v3 = vpop.permute.xlu0 %1041  ;;  %v1024_v4 = vpop.permute.xlu1 %1023 }
 0x34e   : > { %v1078_v5 = vpop.permute.xlu0 %1077  ;;  %v1060_v6 = vpop.permute.xlu1 %1059 }
 0x352   : > { %v1044_v7 = vpop.permute.xlu0 %1043  ;;  %v1026_v0 = vpop.permute.xlu1 %1025 }
 0x353   : > { %v1029_v8 = vsel %vm514_vm1, %v1024_v4, %v1026_v0  ;;  %v1030_v9 = vsel %vm514_vm1, %v1026_v0, %v1028_v63  ;;  %v1048_v10 = vsel %vm552_vm2, %v1044_v7, %v1046_v62  ;;  %v1047_v13 = vsel %vm552_vm2, %v1042_v3, %v1044_v7 }
 0x354   : > { %1191 = vmatprep.subr.bf16.mxu0 %v1030_v9 }
 0x355   : > { %1192 = vmatpush1.bf16.msra.mxu0 %v1029_v8 }
 0x356   : > { %v1100_v11 = vpop.permute.xlu0 %1099  ;;  %v1096_v12 = vpop.permute.xlu1 %1095  ;;  %1193 = vmatprep.subr.bf16.mxu0 %v1048_v10 }
 0x359   : > { %1194 = vmatpush1.bf16.msra.mxu0 %v1047_v13 }
 0x35a   : > { %v1080_v14 = vpop.permute.xlu0 %1079  ;;  %v1062_v15 = vpop.permute.xlu1 %1061 }
 0x35b   : > { %v1065_v16 = vsel %vm590_vm3, %v1060_v6, %v1062_v15  ;;  %v1066_v17 = vsel %vm590_vm3, %v1062_v15, %v1064_v2  ;;  %v1084_v18 = vsel %vm628_vm4, %v1080_v14, %v1082_v1  ;;  %v1083_v21 = vsel %vm628_vm4, %v1078_v5, %v1080_v14 }
 0x35c   : > { %1195 = vmatprep.subr.bf16.mxu0 %v1066_v17 }
 0x35d   : > { %1196 = vmatpush1.bf16.msra.mxu0 %v1065_v16 }
 0x35e   : > { %v1114_v19 = vpop.permute.xlu0 %1113  ;;  %v1118_v20 = vpop.permute.xlu1 %1117  ;;  %1197 = vmatprep.subr.bf16.mxu0 %v1084_v18 }
 0x361   : > { %1198 = vmatpush1.bf16.msra.mxu0 %v1083_v21 }
 0x362   : > { %v1116_v22 = vpop.permute.xlu0 %1115  ;;  %v1098_v23 = vpop.permute.xlu1 %1097 }
 0x363   : > { %v1101_v24 = vsel %vm666_vm5, %v1096_v12, %v1098_v23  ;;  %v1102_v25 = vsel %vm666_vm5, %v1098_v23, %v1100_v11  ;;  %v1120_v26 = vsel %vm704_vm6, %v1116_v22, %v1118_v20  ;;  %v1119_v29 = vsel %vm704_vm6, %v1114_v19, %v1116_v22 }
 0x364   : > { %1199 = vmatprep.subr.bf16.mxu0 %v1102_v25 }
 0x365   : > { %1200 = vmatpush1.bf16.msra.mxu0 %v1101_v24 }
 0x366   : > { %v1136_v27 = vpop.permute.xlu0 %1135  ;;  %v1132_v28 = vpop.permute.xlu1 %1131  ;;  %1201 = vmatprep.subr.bf16.mxu0 %v1120_v26 }
 0x369   : > { %1202 = vmatpush1.bf16.msra.mxu0 %v1119_v29 }
 0x36a   : > { %v1152_v30 = vpop.permute.xlu0 %1151  ;;  %v1134_v31 = vpop.permute.xlu1 %1133 }
 0x36b   : > { %v1137_v32 = vsel %vm742_vm7, %v1132_v28, %v1134_v31  ;;  %v1138_v33 = vsel %vm742_vm7, %v1134_v31, %v1136_v27 }
 0x36c   : > { %1203 = vmatprep.subr.bf16.mxu0 %v1138_v33 }
 0x36d   : > { %1204 = vmatpush1.bf16.msra.mxu0 %v1137_v32 }
 0x36e   : > { %v1150_v34 = vpop.permute.xlu0 %1149  ;;  %v1154_v35 = vpop.permute.xlu1 %1153 }
 0x36f   : > { %v1155_v36 = vsel %vm780_vm8, %v1150_v34, %v1152_v30  ;;  %v1156_v37 = vsel %vm780_vm8, %v1152_v30, %v1154_v35 }
 0x370   : > { %1205 = vmatprep.subr.bf16.mxu0 %v1156_v37 }
 0x371   : > { %1206 = vmatpush1.bf16.msra.mxu0 %v1155_v36 }
 0x374   : > { %1222 = vmatmul.mubr.bf16.vlgmr.msra.gmra.mrb[4].mxu0 %v1498_v38 }
 0x37f   : > { %v1234_v39 = vpop.permute.xlu1 %1233  ;;  %v1242_v43 = vpop.permute.xlu0 %1241 }
 0x447   : > { %v1223_v40 = vpop.f32.mrb[4].mxu0 }
 0x448   : > { %v1236_v41 = vmul.f32 %v1234_v39, %v1223_v40  ;;  %v1225_v42 = vpop.f32.mrb[5].mxu0 }
 0x449   : > { %v1237_v44 = vmul.f32 %v1234_v39, %v1225_v42  ;;  %v1227_v45 = vpop.f32.mrb[6].mxu0 }
 0x44a   : > { %v1244_v46 = vadd.f32 %v1242_v43, %v1236_v41  ;;  %v1228_v47 = vpop.f32.mrb[7].mxu0 }
 0x44b   : > { %v1245_v48 = vadd.f32 %v1242_v43, %v1237_v44 }
 0x44c   : > { %v1246_v49 = vmax.f32 %v1244_v46, 0.0 }
 0x44d   : > { %v1247_v50 = vmax.f32 %v1245_v48, 0.0 }
 0x44e   : > { %1248 = vst [vmem:[%s460_s27] sm:$0xff] %v1246_v49 }
 0x44f   : > { %1249 = vst [vmem:[%s460_s27 + $0x8] sm:$0xff] %v1247_v50 }
 0x450   : > { %1947 = shalt.err (!%p1944_p2)
}
 0x451   : > { %s1948_s17 = scalar_lea.hbm %s2684_s24, 256  ;;  %s1952_s0 = scalar_lea.hbm %s2819_s6, 1024 }
 0x452   : > { %p1949_p4 = scmp.ne.s32.totalorder %s2684_s24, %s1948_s17  ;;  %p1953_p0 = scmp.lt.u32.totalorder %s2684_s24, %s2819_s6 }
 0x453   : > { %p1954_p3 = scmp.lt.u32.totalorder %s1952_s0, %s1948_s17  ;;  %p1956_p6 = scmp.lt.u32.totalorder %s1948_s17, %s2684_s24 }
 0x454   : > { %p1950_p10 = pnand %p1949_p4, %p2820_p5 }
 0x455   : > { %p1955_p1 = por %p1954_p3, %p1953_p0 }
 0x456   : > { %p1951_p11 = pneg %p1950_p10 }
 0x457   : > { %p1957_p13 = por %p1956_p6, %p1955_p1 }
 0x459   : > { %p1958_p8 = pnand %p1957_p13, %p1951_p11 }
 0x45b   : > { %1961 = shalt.err (!%p1958_p8)
}
 0x45c   : > { %1538 = dma.vmem_to_hbm [thread:$0]  (%p2820_p5), %s2686_s16, 256, %s2684_s24, %s1251_s2  }
 0x45d PF: > { %p1583_p7 = scmp.ge.s32.totalorder %s2076_s15, 2  ;;  %s1279_s12 = sand.u32 1, %s2048_s30  }
 0x45e   : > { %p2821_p9 = scmp.ne.s32.totalorder %s2793_s23, 0  ;;  %s1280_s4 = scalar_lea.sflag [#allocation7], %s1279_s12 }
 0x460   : > { %p1567_p12 = pnand %p1583_p7, %p2821_p9 }
 0x462   : > { %2031 = dma.done.wait (!%p1567_p12), %s1280_s4, 256  }
 0x463   : > { %2033 = vsyncadd (!%p1567_p12), %s1280_s4, 4294967040  ;;  %s30_s15 = sadd.s32 1, %s2076_s15   ;;  %s2822_s27 = sld [smem:[#allocation28_spill]] }
 0x464   : > { %p27_p2 = scmp.ge.s32.totalorder %s30_s15, 6   ;;  %s2823_s28 = smov %s2044_s29 }
 0x465   : > { %s2824_s29 = smov %s2464_s8  ;;  %s2825_s30 = smov %s2052_s9 }
 0x466   : > { %s2826_s9 = smov %s2056_s10  ;;  %s2827_s10 = smov %s2411_s19 }
 0x467   : > { %s2828_s11 = smov %s2068_s13  ;;  %s2829_s12 = smov %s2072_s14 }
 0x468   : > { %s2830_s13 = smov %s2833_s20  ;;  %s2831_s14 = smov %s2837_s25 }
 0x469   :  { %29 = sbr.rel (!%p27_p2) target bundleno = 23 (0x17), region = 134 }
 0x470   :  { %1285 = vsyncpa [#allocation6], 1 }
 0x471   :  { %1287 = vsyncpa [#allocation6 + $0x1], 1 }
 0x472   :  { %1288 = vsyncpa [#allocation9], 1 }
 0x473   :  { %1290 = vsyncpa [#allocation9 + $0x1], 1 }
 0x474   :  { %1291 = vsyncpa [#allocation12], 1 }
 0x475   :  { %1292 = vsyncpa [#allocation15], 1 }
 0x476   :  { %1293 = vsyncpa [#allocation18], 1 }
 0x477   :  { %1294 = vsyncpa [#allocation7], 1 }
 0x478   :  { %1296 = vsyncpa [#allocation7 + $0x1], 1 }

</bundles_post_ra>
